<compile_context>
chip_gen: v7x
topology: tpu7x:2x2x1
jax: 0.10.0
libtpu: 0.0.40
codegen_flags: <defaults>
</compile_context>

<pallas_src>
import functools

import jax
import jax.numpy as jnp
from jax.experimental import pallas as pl
from jax.experimental.pallas import tpu as pltpu

IN_DIM = 784        # 28*28, fixed by the module
HIDDEN_DIM = 128    # small stand-in for 500 (pad 500 -> 512 for real runs)
Z_DIM = 20
BATCH = 8


def _round_up(n, m):
    return ((n + m - 1) // m) * m


def _layout(hidden_dim, z_dim):
    """128-lane-aligned offsets of each bias segment in the packed bias array,
    plus the padded per-branch width of the fused encoder layer-2 output."""
    zp = _round_up(z_dim, 128)                         # padded z width (mean / std lanes)
    off_b1 = 0                                         # [1, 2H]    fused encoder L1 bias
    off_b2 = _round_up(2 * hidden_dim, 128)            # [1, 2*zp]  fused encoder L2 bias
    off_bd1 = off_b2 + 2 * zp                          # [1, H]     decoder L1 bias
    off_bd2 = off_bd1 + _round_up(hidden_dim, 128)     # [1, 784]   decoder L2 bias
    total = off_bd2 + _round_up(IN_DIM, 128)
    return zp, off_b1, off_b2, off_bd1, off_bd2, total


def _vae_kernel(x_ref, w1_ref, w2_ref, wd1_ref, wd2_ref, bias_ref, eps_ref,
                loss_ref, *, hidden_dim, z_dim):
    H, Z = hidden_dim, z_dim
    zp, off_b1, off_b2, off_bd1, off_bd2, _ = _layout(H, Z)

    x = x_ref[...]                                                  # [TB, 784]
    b1 = bias_ref[:, off_b1:off_b1 + 2 * H]                         # [1, 2H]
    b2 = bias_ref[:, off_b2:off_b2 + 2 * zp]                        # [1, 2*zp]
    bd1 = bias_ref[:, off_bd1:off_bd1 + H]                          # [1, H]
    bd2 = bias_ref[:, off_bd2:off_bd2 + IN_DIM]                     # [1, 784]

    # ---- Fused encoder, layer 1: one MXU pass covers both ReLU branches ----
    h = jnp.dot(x, w1_ref[...], preferred_element_type=jnp.float32) + b1
    h = jnp.maximum(h, 0.0)                                         # [TB, 2H]

    # ---- Fused encoder, layer 2 (block-diagonal weights) -> [mean | std] ----
    ms = jnp.dot(h, w2_ref[...], preferred_element_type=jnp.float32) + b2
    mean = ms[:, :Z]                                                # [TB, Z] (lanes 0..)
    std = ms[:, zp:zp + Z]                                          # [TB, Z] (128-aligned)

    # ---- Reparameterization: epsilons [1, Z] broadcast over the batch ------
    z = mean + std * eps_ref[...]                                   # [TB, Z]

    # ---- Decoder -------------------------------------------------------------
    hd = jnp.dot(z, wd1_ref[...], preferred_element_type=jnp.float32) + bd1
    hd = jnp.maximum(hd, 0.0)                                       # [TB, H]
    logits = jnp.dot(hd, wd2_ref[...], preferred_element_type=jnp.float32) + bd2

    # ---- log-Bernoulli reconstruction loss via BCE-with-logits --------------
    #   -[x*log(sigmoid(l)) + (1-x)*log(1-sigmoid(l))]
    #       = max(l, 0) - l*x + log1p(exp(-|l|))
    rec = jnp.sum(jnp.maximum(logits, 0.0) - logits * x
                  + jnp.log1p(jnp.exp(-jnp.abs(logits))),
                  axis=1, keepdims=True)                            # [TB, 1]

    # ---- KL(q(z|x) || N(0,I)) with sigma = std (raw linear output) ----------
    # NOTE: log(std**2) is -inf if std == 0 -- faithful to the reference module.
    var = std * std
    kl = -0.5 * jnp.sum(1.0 + jnp.log(var) - mean * mean - var,
                        axis=1, keepdims=True)                      # [TB, 1]

    loss_ref[...] = rec + kl


def vae_forward_pallas(x, params, epsilons, *, hidden_dim=HIDDEN_DIM, z_dim=Z_DIM):
    """x: any shape reshapable to [B, 784].  Returns scalar negative avg ELBO."""
    H, Z = hidden_dim, z_dim
    x = x.reshape(-1, IN_DIM).astype(jnp.float32)      # input.view(-1, 784)
    B = x.shape[0]

    # Batch tiling: tile toward the MXU M dimension when the batch is big enough.
    tile_b = min(128, _round_up(B, 8))
    b_pad = _round_up(B, tile_b)
    if b_pad != B:
        x = jnp.pad(x, ((0, b_pad - B), (0, 0)))
    grid = (b_pad // tile_b,)

    # ---- Host-side operand fusion (constant-folded / fused by XLA under jit) --
    zp, off_b1, off_b2, off_bd1, off_bd2, total = _layout(H, Z)

    w1 = jnp.concatenate([params["w1m"], params["w1s"]], axis=1)           # [784, 2H]
    w2 = jnp.zeros((2 * H, 2 * zp), jnp.float32)                           # block-diag,
    w2 = w2.at[:H, :Z].set(params["w2m"]).at[H:, zp:zp + Z].set(params["w2s"])
    wd1 = params["wd1"]                                                    # [Z, H]
    wd2 = params["wd2"]                                                    # [H, 784]

    biases = jnp.zeros((1, total), jnp.float32)
    biases = biases.at[:, off_b1:off_b1 + H].set(params["b1m"])
    biases = biases.at[:, off_b1 + H:off_b1 + 2 * H].set(params["b1s"])
    biases = biases.at[:, off_b2:off_b2 + Z].set(params["b2m"])
    biases = biases.at[:, off_b2 + zp:off_b2 + zp + Z].set(params["b2s"])
    biases = biases.at[:, off_bd1:off_bd1 + H].set(params["bd1"])
    biases = biases.at[:, off_bd2:off_bd2 + IN_DIM].set(params["bd2"])

    # Weights / biases / eps: whole-array blocks with constant index_map so they
    # stay VMEM-resident across the (parallel) batch-tile grid.
    const = lambda shape: pl.BlockSpec(shape, lambda i: (0, 0))

    losses = pl.pallas_call(
        functools.partial(_vae_kernel, hidden_dim=H, z_dim=Z),
        out_shape=jax.ShapeDtypeStruct((b_pad, 1), jnp.float32),
        grid=grid,
        in_specs=[
            pl.BlockSpec((tile_b, IN_DIM), lambda i: (i, 0)),   # x (batch-tiled)
            const((IN_DIM, 2 * H)),                             # fused encoder L1
            const((2 * H, 2 * zp)),                             # fused encoder L2 (blockdiag)
            const((Z, H)),                                      # decoder L1
            const((H, IN_DIM)),                                 # decoder L2
            const((1, total)),                                  # packed biases
            const((1, Z)),                                      # epsilons
        ],
        out_specs=pl.BlockSpec((tile_b, 1), lambda i: (i, 0)),
        compiler_params=pltpu.CompilerParams(
            dimension_semantics=("parallel",)),
    )(x, w1, w2, wd1, wd2, biases, epsilons)

    # Per-sample losses -> mean over the real batch (padded rows dropped).
    return jnp.mean(losses[:B, 0])


def vae_forward_ref(x, params, epsilons):
    """Pure-JAX reference matching the PyTorch forward exactly (incl. 1e-8 eps)."""
    e = 1e-8
    h_m = jnp.maximum(x @ params["w1m"] + params["b1m"], 0.0)
    mean = h_m @ params["w2m"] + params["b2m"]
    h_s = jnp.maximum(x @ params["w1s"] + params["b1s"], 0.0)
    std = h_s @ params["w2s"] + params["b2s"]
    z = mean + std * epsilons
    h_d = jnp.maximum(z @ params["wd1"] + params["bd1"], 0.0)
    r = jax.nn.sigmoid(h_d @ params["wd2"] + params["bd2"])
    rec = -jnp.sum(x * jnp.log(r + e) + (1 - x) * jnp.log(1 - r + e), axis=1)
    var = std * std
    kl = -jnp.sum(1 + jnp.log(var) - mean * mean - var, axis=1) / 2.0
    return jnp.mean(rec + kl)


def _linear_params(key, fan_in, fan_out):
    # PyTorch nn.Linear default init: U(-1/sqrt(fan_in), 1/sqrt(fan_in))
    kw, kb = jax.random.split(key)
    bound = 1.0 / (fan_in ** 0.5)
    w = jax.random.uniform(kw, (fan_in, fan_out), jnp.float32, -bound, bound)
    b = jax.random.uniform(kb, (1, fan_out), jnp.float32, -bound, bound)
    return w, b


def init_params(key, hidden_dim=HIDDEN_DIM, z_dim=Z_DIM):
    keys = jax.random.split(key, 6)
    w1m, b1m = _linear_params(keys[0], IN_DIM, hidden_dim)
    w2m, b2m = _linear_params(keys[1], hidden_dim, z_dim)
    w1s, b1s = _linear_params(keys[2], IN_DIM, hidden_dim)
    w2s, b2s = _linear_params(keys[3], hidden_dim, z_dim)
    wd1, bd1 = _linear_params(keys[4], z_dim, hidden_dim)
    wd2, bd2 = _linear_params(keys[5], hidden_dim, IN_DIM)
    return dict(w1m=w1m, b1m=b1m, w2m=w2m, b2m=b2m,
                w1s=w1s, b1s=b1s, w2s=w2s, b2s=b2s,
                wd1=wd1, bd1=bd1, wd2=wd2, bd2=bd2)


if __name__ == "__main__":
    key = jax.random.PRNGKey(0)
    k_param, k_x, k_eps = jax.random.split(key, 3)

    params = init_params(k_param)
    # MNIST-like pixel values in [0, 1]; the wrapper flattens to [B, 784]
    # exactly like the module's input.view(-1, 784).
    x = jax.random.uniform(k_x, (BATCH, 1, 28, 28), jnp.float32, 0.0, 1.0)
    # torch.randn((1, z_dim)) inside forward -> hoisted to a deterministic input.
    epsilons = jax.random.normal(k_eps, (1, Z_DIM), jnp.float32)

    elbo = jax.jit(vae_forward_pallas)(x, params, epsilons)
    jax.block_until_ready(elbo)

    ref = vae_forward_ref(x.reshape(-1, IN_DIM), params, epsilons)
    assert jnp.allclose(elbo, ref, rtol=1e-4, atol=1e-3), (elbo, ref)

    print("KERNEL_OK")
</pallas_src>

<mosaic_0001>
module attributes {stable_mosaic.version = 11 : i64} {
  func.func @_vae_kernel(%arg0: i32, %arg1: memref<8x784xf32, #tpu.memory_space<vmem>>, %arg2: memref<784x256xf32, #tpu.memory_space<vmem>>, %arg3: memref<256x256xf32, #tpu.memory_space<vmem>>, %arg4: memref<20x128xf32, #tpu.memory_space<vmem>>, %arg5: memref<128x784xf32, #tpu.memory_space<vmem>>, %arg6: memref<1x1536xf32, #tpu.memory_space<vmem>>, %arg7: memref<1x20xf32, #tpu.memory_space<vmem>>, %arg8: memref<8x1xf32, #tpu.memory_space<vmem>>) attributes {dimension_semantics = [#tpu.dimension_semantics<parallel>], iteration_bounds = array<i64: 1>, scalar_prefetch = 0 : i64, scratch_operands = 0 : i64, tpu.core_type = #tpu.core_type<tc>, window_params = [{transform_indices = @transform_0, window_bounds = array<i64: 8, 784>}, {pipeline_mode = #tpu.pipeline_mode<synchronous>, transform_indices = @transform_1, window_bounds = array<i64: 784, 256>}, {pipeline_mode = #tpu.pipeline_mode<synchronous>, transform_indices = @transform_2, window_bounds = array<i64: 256, 256>}, {pipeline_mode = #tpu.pipeline_mode<synchronous>, transform_indices = @transform_3, window_bounds = array<i64: 20, 128>}, {pipeline_mode = #tpu.pipeline_mode<synchronous>, transform_indices = @transform_4, window_bounds = array<i64: 128, 784>}, {pipeline_mode = #tpu.pipeline_mode<synchronous>, transform_indices = @transform_5, window_bounds = array<i64: 1, 1536>}, {pipeline_mode = #tpu.pipeline_mode<synchronous>, transform_indices = @transform_6, window_bounds = array<i64: 1, 20>}, {transform_indices = @transform_7, window_bounds = array<i64: 8, 1>}]} {
    %c0 = arith.constant 0 : index
    %c0_0 = arith.constant 0 : index
    %0 = vector.load %arg1[%c0, %c0_0] : memref<8x784xf32, #tpu.memory_space<vmem>>, vector<8x784xf32>
    %c0_1 = arith.constant 0 : index
    %c0_2 = arith.constant 0 : index
    %1 = vector.load %arg6[%c0_1, %c0_2] : memref<1x1536xf32, #tpu.memory_space<vmem>>, vector<1x256xf32>
    %c0_3 = arith.constant 0 : index
    %c256 = arith.constant 256 : index
    %2 = vector.load %arg6[%c0_3, %c256] : memref<1x1536xf32, #tpu.memory_space<vmem>>, vector<1x256xf32>
    %c0_4 = arith.constant 0 : index
    %c512 = arith.constant 512 : index
    %3 = vector.load %arg6[%c0_4, %c512] : memref<1x1536xf32, #tpu.memory_space<vmem>>, vector<1x128xf32>
    %c0_5 = arith.constant 0 : index
    %c640 = arith.constant 640 : index
    %4 = vector.load %arg6[%c0_5, %c640] : memref<1x1536xf32, #tpu.memory_space<vmem>>, vector<1x784xf32>
    %c0_6 = arith.constant 0 : index
    %c0_7 = arith.constant 0 : index
    %5 = vector.load %arg2[%c0_6, %c0_7] : memref<784x256xf32, #tpu.memory_space<vmem>>, vector<784x256xf32>
    %cst = arith.constant dense<0.000000e+00> : vector<8x256xf32>
    %6 = tpu.matmul %0, %5, %cst {dimension_numbers = #tpu.dot_dimension_numbers<[1], [0], [0], [1], [0, 0, 1, 1], [], []>} : vector<8x784xf32>, vector<784x256xf32>, vector<8x256xf32> -> vector<8x256xf32>
    %7 = vector.broadcast %1 : vector<1x256xf32> to vector<8x256xf32>
    %8 = arith.addf %6, %7 : vector<8x256xf32>
    %cst_8 = arith.constant 0.000000e+00 : f32
    %9 = vector.broadcast %cst_8 : f32 to vector<8x256xf32>
    %10 = arith.maximumf %8, %9 : vector<8x256xf32>
    %c0_9 = arith.constant 0 : index
    %c0_10 = arith.constant 0 : index
    %11 = vector.load %arg3[%c0_9, %c0_10] : memref<256x256xf32, #tpu.memory_space<vmem>>, vector<256x256xf32>
    %cst_11 = arith.constant dense<0.000000e+00> : vector<8x256xf32>
    %12 = tpu.matmul %10, %11, %cst_11 {dimension_numbers = #tpu.dot_dimension_numbers<[1], [0], [0], [1], [0, 0, 1, 1], [], []>} : vector<8x256xf32>, vector<256x256xf32>, vector<8x256xf32> -> vector<8x256xf32>
    %13 = vector.broadcast %2 : vector<1x256xf32> to vector<8x256xf32>
    %14 = arith.addf %12, %13 : vector<8x256xf32>
    %15 = vector.extract_strided_slice %14 {offsets = [0, 0], sizes = [8, 20], strides = [1, 1]} : vector<8x256xf32> to vector<8x20xf32>
    %16 = vector.extract_strided_slice %14 {offsets = [0, 128], sizes = [8, 20], strides = [1, 1]} : vector<8x256xf32> to vector<8x20xf32>
    %c0_12 = arith.constant 0 : index
    %c0_13 = arith.constant 0 : index
    %17 = vector.load %arg7[%c0_12, %c0_13] : memref<1x20xf32, #tpu.memory_space<vmem>>, vector<1x20xf32>
    %18 = vector.broadcast %17 : vector<1x20xf32> to vector<8x20xf32>
    %19 = arith.mulf %16, %18 : vector<8x20xf32>
    %20 = arith.addf %15, %19 : vector<8x20xf32>
    %c0_14 = arith.constant 0 : index
    %c0_15 = arith.constant 0 : index
    %21 = vector.load %arg4[%c0_14, %c0_15] : memref<20x128xf32, #tpu.memory_space<vmem>>, vector<20x128xf32>
    %cst_16 = arith.constant dense<0.000000e+00> : vector<8x128xf32>
    %22 = tpu.matmul %20, %21, %cst_16 {dimension_numbers = #tpu.dot_dimension_numbers<[1], [0], [0], [1], [0, 0, 1, 1], [], []>} : vector<8x20xf32>, vector<20x128xf32>, vector<8x128xf32> -> vector<8x128xf32>
    %23 = vector.broadcast %3 : vector<1x128xf32> to vector<8x128xf32>
    %24 = arith.addf %22, %23 : vector<8x128xf32>
    %cst_17 = arith.constant 0.000000e+00 : f32
    %25 = vector.broadcast %cst_17 : f32 to vector<8x128xf32>
    %26 = arith.maximumf %24, %25 : vector<8x128xf32>
    %c0_18 = arith.constant 0 : index
    %c0_19 = arith.constant 0 : index
    %27 = vector.load %arg5[%c0_18, %c0_19] : memref<128x784xf32, #tpu.memory_space<vmem>>, vector<128x784xf32>
    %cst_20 = arith.constant dense<0.000000e+00> : vector<8x784xf32>
    %28 = tpu.matmul %26, %27, %cst_20 {dimension_numbers = #tpu.dot_dimension_numbers<[1], [0], [0], [1], [0, 0, 1, 1], [], []>} : vector<8x128xf32>, vector<128x784xf32>, vector<8x784xf32> -> vector<8x784xf32>
    %29 = vector.broadcast %4 : vector<1x784xf32> to vector<8x784xf32>
    %30 = arith.addf %28, %29 : vector<8x784xf32>
    %cst_21 = arith.constant 0.000000e+00 : f32
    %31 = vector.broadcast %cst_21 : f32 to vector<8x784xf32>
    %32 = arith.maximumf %30, %31 : vector<8x784xf32>
    %33 = arith.mulf %30, %0 : vector<8x784xf32>
    %34 = arith.subf %32, %33 : vector<8x784xf32>
    %35 = math.absf %30 : vector<8x784xf32>
    %cst_22 = arith.constant 0.000000e+00 : f32
    %36 = vector.broadcast %cst_22 : f32 to vector<8x784xf32>
    %37 = arith.subf %36, %35 : vector<8x784xf32>
    %38 = math.exp %37 : vector<8x784xf32>
    %39 = math.log1p %38 : vector<8x784xf32>
    %40 = arith.addf %34, %39 : vector<8x784xf32>
    %cst_23 = arith.constant dense<0.000000e+00> : vector<8xf32>
    %41 = vector.multi_reduction <add>, %40, %cst_23 [1] : vector<8x784xf32> to vector<8xf32>
    %42 = vector.shape_cast %41 : vector<8xf32> to vector<8x1xf32>
    %43 = arith.mulf %16, %16 : vector<8x20xf32>
    %44 = math.log %43 : vector<8x20xf32>
    %cst_24 = arith.constant 1.000000e+00 : f32
    %45 = vector.broadcast %cst_24 : f32 to vector<8x20xf32>
    %46 = arith.addf %45, %44 : vector<8x20xf32>
    %47 = arith.mulf %15, %15 : vector<8x20xf32>
    %48 = arith.subf %46, %47 : vector<8x20xf32>
    %49 = arith.subf %48, %43 : vector<8x20xf32>
    %cst_25 = arith.constant dense<0.000000e+00> : vector<8xf32>
    %50 = vector.multi_reduction <add>, %49, %cst_25 [1] : vector<8x20xf32> to vector<8xf32>
    %51 = vector.shape_cast %50 : vector<8xf32> to vector<8x1xf32>
    %cst_26 = arith.constant -5.000000e-01 : f32
    %52 = vector.broadcast %cst_26 : f32 to vector<8x1xf32>
    %53 = arith.mulf %52, %51 : vector<8x1xf32>
    %54 = arith.addf %42, %53 : vector<8x1xf32>
    %c0_27 = arith.constant 0 : index
    %c0_28 = arith.constant 0 : index
    %55 = vector.load %arg8[%c0_27, %c0_28] : memref<8x1xf32, #tpu.memory_space<vmem>>, vector<8x1xf32>
    tpu.vector_store %arg8[%c0_27, %c0_28], %54 {strides = array<i32>} : memref<8x1xf32, #tpu.memory_space<vmem>>, vector<8x1xf32>,
    return
  }
  func.func @transform_0(%arg0: i32) -> (i32, i32) {
    %c0_i32 = arith.constant 0 : i32
    %c0_i32_0 = arith.constant 0 : i32
    return %arg0, %c0_i32 : i32, i32
  }
  func.func @transform_1(%arg0: i32) -> (i32, i32) {
    %c0_i32 = arith.constant 0 : i32
    %c0_i32_0 = arith.constant 0 : i32
    %c0_i32_1 = arith.constant 0 : i32
    return %c0_i32, %c0_i32_0 : i32, i32
  }
  func.func @transform_2(%arg0: i32) -> (i32, i32) {
    %c0_i32 = arith.constant 0 : i32
    %c0_i32_0 = arith.constant 0 : i32
    %c0_i32_1 = arith.constant 0 : i32
    return %c0_i32, %c0_i32_0 : i32, i32
  }
  func.func @transform_3(%arg0: i32) -> (i32, i32) {
    %c0_i32 = arith.constant 0 : i32
    %c0_i32_0 = arith.constant 0 : i32
    %c0_i32_1 = arith.constant 0 : i32
    return %c0_i32, %c0_i32_0 : i32, i32
  }
  func.func @transform_4(%arg0: i32) -> (i32, i32) {
    %c0_i32 = arith.constant 0 : i32
    %c0_i32_0 = arith.constant 0 : i32
    %c0_i32_1 = arith.constant 0 : i32
    return %c0_i32, %c0_i32_0 : i32, i32
  }
  func.func @transform_5(%arg0: i32) -> (i32, i32) {
    %c0_i32 = arith.constant 0 : i32
    %c0_i32_0 = arith.constant 0 : i32
    %c0_i32_1 = arith.constant 0 : i32
    return %c0_i32, %c0_i32_0 : i32, i32
  }
  func.func @transform_6(%arg0: i32) -> (i32, i32) {
    %c0_i32 = arith.constant 0 : i32
    %c0_i32_0 = arith.constant 0 : i32
    %c0_i32_1 = arith.constant 0 : i32
    return %c0_i32, %c0_i32_0 : i32, i32
  }
  func.func @transform_7(%arg0: i32) -> (i32, i32) {
    %c0_i32 = arith.constant 0 : i32
    %c0_i32_0 = arith.constant 0 : i32
    return %arg0, %c0_i32 : i32, i32
  }
}

</mosaic_0001>

<bundles_post_ra>
// kernel: vae_forward_pallas.1
= control target key start
LH: loop header
LB: loop body
LE: loop exit
PB: predicated region body
PF: predicated region fallthrough
CT: control target
= control target key end

     0   :  { %vm244_vm0 = vcmask 130048   ;;  %vm702_vm1 = vcmask 1043456   ;;  %vm1855_vm2 = vmmov 0   ;;  %vm698_vm3 = vcmask 162816   ;;  %s3137_s1 = inlined_call_operand.vmem [shape: f32[784,256], index: 1, kind: input, shape index: {}]   ;;  %s3138_s0 = inlined_call_operand.vmem [shape: f32[8,784], index: 0, kind: input, shape index: {}]   ;;  %s3139_s2 = inlined_call_operand.vmem [shape: f32[256,256], index: 2, kind: input, shape index: {}]   ;;  %s3140_s5 = inlined_call_operand.vmem [shape: f32[1,1536], index: 5, kind: input, shape index: {}]   ;;  %s3141_s3 = inlined_call_operand.vmem [shape: f32[20,128], index: 3, kind: input, shape index: {}]   ;;  %s3142_s6 = inlined_call_operand.vmem [shape: f32[1,20], index: 6, kind: input, shape index: {}]   ;;  %s3143_s4 = inlined_call_operand.vmem [shape: f32[128,784], index: 4, kind: input, shape index: {}]   ;;  %s3144_s7 = inlined_call_operand.vmem [shape: f32[8,1], index: 7, kind: output, shape index: {}]  }
   0x1   :  { %v38_v0 = vld [vmem:[%s3137_s1 + $0x8] sm:$0xff]  ;;  %v40_v1 = vld [vmem:[%s3137_s1 + $0x18] sm:$0xff]  ;;  %v37_v2 = vld [vmem:[%s3137_s1] sm:$0xff]  ;;  %vm1348_vm11 = vcmask 7168  }
   0x2   :  { %v1424_v3 = vpack.c.bf16 %v40_v1, %v38_v0  ;;  %v39_v4 = vld [vmem:[%s3137_s1 + $0x10] sm:$0xff]  ;;  %v42_v5 = vld [vmem:[%s3137_s1 + $0x28] sm:$0xff]  ;;  %v44_v6 = vld [vmem:[%s3137_s1 + $0x38] sm:$0xff] }
   0x3   :  { %v1426_v7 = vpack.c.bf16 %v39_v4, %v37_v2  ;;  %v1428_v8 = vpack.c.bf16 %v44_v6, %v42_v5  ;;  %v41_v9 = vld [vmem:[%s3137_s1 + $0x20] sm:$0xff]  ;;  %v43_v10 = vld [vmem:[%s3137_s1 + $0x30] sm:$0xff]  ;;  %v46_v11 = vld [vmem:[%s3137_s1 + $0x48] sm:$0xff] }
   0x4   :  { %1425 = vmatprep.subr.bf16.mxu0 %v1424_v3  ;;  %v48_v12 = vld [vmem:[%s3137_s1 + $0x58] sm:$0xff]  ;;  %v1430_v13 = vpack.c.bf16 %v43_v10, %v41_v9  ;;  %v45_v15 = vld [vmem:[%s3137_s1 + $0x40] sm:$0xff]  ;;  %v47_v16 = vld [vmem:[%s3137_s1 + $0x50] sm:$0xff] }
   0x5   :  { %1427 = vmatpush1.bf16.msra.mxu0 %v1426_v7  ;;  %v1432_v14 = vpack.c.bf16 %v48_v12, %v46_v11  ;;  %v50_v17 = vld [vmem:[%s3137_s1 + $0x68] sm:$0xff]  ;;  %v52_v18 = vld [vmem:[%s3137_s1 + $0x78] sm:$0xff]  ;;  %v1434_v19 = vpack.c.bf16 %v47_v16, %v45_v15  ;;  %v49_v21 = vld [vmem:[%s3137_s1 + $0x60] sm:$0xff] }
   0x6   :  { %1429 = vmatprep.subr.bf16.mxu0 %v1428_v8  ;;  %v1436_v20 = vpack.c.bf16 %v52_v18, %v50_v17  ;;  %v51_v22 = vld [vmem:[%s3137_s1 + $0x70] sm:$0xff]  ;;  %v54_v23 = vld [vmem:[%s3137_s1 + $0x88] sm:$0xff]  ;;  %v56_v24 = vld [vmem:[%s3137_s1 + $0x98] sm:$0xff] }
   0x7   :  { %v1438_v25 = vpack.c.bf16 %v51_v22, %v49_v21  ;;  %v1440_v26 = vpack.c.bf16 %v56_v24, %v54_v23  ;;  %v53_v27 = vld [vmem:[%s3137_s1 + $0x80] sm:$0xff]  ;;  %v55_v28 = vld [vmem:[%s3137_s1 + $0x90] sm:$0xff]  ;;  %v58_v29 = vld [vmem:[%s3137_s1 + $0xa8] sm:$0xff] }
   0x8   :  { %v60_v30 = vld [vmem:[%s3137_s1 + $0xb8] sm:$0xff]  ;;  %v1442_v31 = vpack.c.bf16 %v55_v28, %v53_v27  ;;  %v57_v33 = vld [vmem:[%s3137_s1 + $0xa0] sm:$0xff]  ;;  %v59_v34 = vld [vmem:[%s3137_s1 + $0xb0] sm:$0xff] }
   0x9   :  { %1431 = vmatpush1.bf16.msra.mxu0 %v1430_v13  ;;  %v1444_v32 = vpack.c.bf16 %v60_v30, %v58_v29  ;;  %v62_v35 = vld [vmem:[%s3137_s1 + $0xc8] sm:$0xff]  ;;  %v64_v36 = vld [vmem:[%s3137_s1 + $0xd8] sm:$0xff]  ;;  %v1446_v37 = vpack.c.bf16 %v59_v34, %v57_v33  ;;  %v61_v39 = vld [vmem:[%s3137_s1 + $0xc0] sm:$0xff] }
   0xa   :  { %1433 = vmatprep.subr.bf16.mxu0 %v1432_v14  ;;  %v1448_v38 = vpack.c.bf16 %v64_v36, %v62_v35  ;;  %v63_v40 = vld [vmem:[%s3137_s1 + $0xd0] sm:$0xff]  ;;  %v27_v41 = vld [vmem:[%s3138_s0 + $0x8] sm:$0xff]  ;;  %v68_v43 = vld [vmem:[%s3137_s1 + $0xf8] sm:$0xff] }
   0xb   :  { %v66_v42 = vld [vmem:[%s3137_s1 + $0xe8] sm:$0xff]  ;;  %312 = vmatprep.mubr.f32.mxu0 %v27_v41  ;;  %v1450_v44 = vpack.c.bf16 %v63_v40, %v61_v39  ;;  %v65_v46 = vld [vmem:[%s3137_s1 + $0xe0] sm:$0xff]  ;;  %v67_v47 = vld [vmem:[%s3137_s1 + $0xf0] sm:$0xff] }
   0xc   :  { %v1452_v45 = vpack.c.bf16 %v68_v43, %v66_v42  ;;  %v70_v48 = vld [vmem:[%s3137_s1 + $0x108] sm:$0xff]  ;;  %v72_v49 = vld [vmem:[%s3137_s1 + $0x118] sm:$0xff]  ;;  %v1454_v50 = vpack.c.bf16 %v67_v47, %v65_v46  ;;  %v69_v52 = vld [vmem:[%s3137_s1 + $0x100] sm:$0xff] }
   0xd   :  { %1435 = vmatpush1.bf16.msra.mxu0 %v1434_v19  ;;  %v1456_v51 = vpack.c.bf16 %v72_v49, %v70_v48  ;;  %v71_v53 = vld [vmem:[%s3137_s1 + $0x110] sm:$0xff]  ;;  %v74_v54 = vld [vmem:[%s3137_s1 + $0x128] sm:$0xff]  ;;  %v76_v55 = vld [vmem:[%s3137_s1 + $0x138] sm:$0xff] }
   0xe   :  { %1437 = vmatprep.subr.bf16.mxu0 %v1436_v20  ;;  %v1458_v56 = vpack.c.bf16 %v71_v53, %v69_v52  ;;  %v1460_v57 = vpack.c.bf16 %v76_v55, %v74_v54  ;;  %v73_v58 = vld [vmem:[%s3137_s1 + $0x120] sm:$0xff]  ;;  %v75_v59 = vld [vmem:[%s3137_s1 + $0x130] sm:$0xff]  ;;  %v78_v60 = vld [vmem:[%s3137_s1 + $0x148] sm:$0xff] }
   0xf   :  { %v80_v61 = vld [vmem:[%s3137_s1 + $0x158] sm:$0xff]  ;;  %v1462_v62 = vpack.c.bf16 %v75_v59, %v73_v58  ;;  %v77_v0 = vld [vmem:[%s3137_s1 + $0x140] sm:$0xff]  ;;  %v79_v1 = vld [vmem:[%s3137_s1 + $0x150] sm:$0xff] }
  0x10   :  { %v1464_v63 = vpack.c.bf16 %v80_v61, %v78_v60  ;;  %v82_v2 = vld [vmem:[%s3137_s1 + $0x168] sm:$0xff]  ;;  %v84_v3 = vld [vmem:[%s3137_s1 + $0x178] sm:$0xff]  ;;  %v1466_v4 = vpack.c.bf16 %v79_v1, %v77_v0  ;;  %v81_v6 = vld [vmem:[%s3137_s1 + $0x160] sm:$0xff] }
  0x11   :  { %1439 = vmatpush1.bf16.msra.mxu0 %v1438_v25  ;;  %v1468_v5 = vpack.c.bf16 %v84_v3, %v82_v2  ;;  %v83_v7 = vld [vmem:[%s3137_s1 + $0x170] sm:$0xff]  ;;  %v86_v8 = vld [vmem:[%s3137_s1 + $0x188] sm:$0xff]  ;;  %v88_v9 = vld [vmem:[%s3137_s1 + $0x198] sm:$0xff] }
  0x12   :  { %1441 = vmatprep.subr.bf16.mxu0 %v1440_v26  ;;  %v1470_v10 = vpack.c.bf16 %v83_v7, %v81_v6  ;;  %v1472_v11 = vpack.c.bf16 %v88_v9, %v86_v8  ;;  %v85_v12 = vld [vmem:[%s3137_s1 + $0x180] sm:$0xff]  ;;  %v87_v13 = vld [vmem:[%s3137_s1 + $0x190] sm:$0xff]  ;;  %v90_v14 = vld [vmem:[%s3137_s1 + $0x1a8] sm:$0xff] }
  0x13   :  { %v92_v15 = vld [vmem:[%s3137_s1 + $0x1b8] sm:$0xff]  ;;  %v1474_v16 = vpack.c.bf16 %v87_v13, %v85_v12  ;;  %v89_v18 = vld [vmem:[%s3137_s1 + $0x1a0] sm:$0xff]  ;;  %v91_v19 = vld [vmem:[%s3137_s1 + $0x1b0] sm:$0xff] }
  0x14   :  { %v1476_v17 = vpack.c.bf16 %v92_v15, %v90_v14  ;;  %v94_v20 = vld [vmem:[%s3137_s1 + $0x1c8] sm:$0xff]  ;;  %v96_v21 = vld [vmem:[%s3137_s1 + $0x1d8] sm:$0xff]  ;;  %v1478_v22 = vpack.c.bf16 %v91_v19, %v89_v18  ;;  %v93_v24 = vld [vmem:[%s3137_s1 + $0x1c0] sm:$0xff] }
  0x15   :  { %1443 = vmatpush1.bf16.msra.mxu0 %v1442_v31  ;;  %v1480_v23 = vpack.c.bf16 %v96_v21, %v94_v20  ;;  %v95_v25 = vld [vmem:[%s3137_s1 + $0x1d0] sm:$0xff]  ;;  %v98_v26 = vld [vmem:[%s3137_s1 + $0x1e8] sm:$0xff]  ;;  %v100_v27 = vld [vmem:[%s3137_s1 + $0x1f8] sm:$0xff] }
  0x16   :  { %1445 = vmatprep.subr.bf16.mxu0 %v1444_v32  ;;  %v1482_v28 = vpack.c.bf16 %v95_v25, %v93_v24  ;;  %v1484_v29 = vpack.c.bf16 %v100_v27, %v98_v26  ;;  %v97_v30 = vld [vmem:[%s3137_s1 + $0x1e0] sm:$0xff]  ;;  %v99_v31 = vld [vmem:[%s3137_s1 + $0x1f0] sm:$0xff]  ;;  %v102_v32 = vld [vmem:[%s3137_s1 + $0x208] sm:$0xff] }
  0x17   :  { %v104_v33 = vld [vmem:[%s3137_s1 + $0x218] sm:$0xff]  ;;  %v1486_v34 = vpack.c.bf16 %v99_v31, %v97_v30  ;;  %v101_v36 = vld [vmem:[%s3137_s1 + $0x200] sm:$0xff]  ;;  %v110_v46 = vld [vmem:[%s3137_s1 + $0x248] sm:$0xff] }
  0x18   :  { %v1488_v35 = vpack.c.bf16 %v104_v33, %v102_v32  ;;  %v108_v39 = vld [vmem:[%s3137_s1 + $0x238] sm:$0xff]  ;;  %v26_v40 = vld [vmem:[%s3138_s0] sm:$0xff]  ;;  %v114_v52 = vld [vmem:[%s3137_s1 + $0x268] sm:$0xff] }
  0x19   :  { %1447 = vmatpush1.bf16.msra.mxu0 %v1446_v37  ;;  %v103_v37 = vld [vmem:[%s3137_s1 + $0x210] sm:$0xff]  ;;  %v105_v43 = vld [vmem:[%s3137_s1 + $0x220] sm:$0xff]  ;;  %v112_v47 = vld [vmem:[%s3137_s1 + $0x258] sm:$0xff] }
  0x1a   :  { %1449 = vmatprep.subr.bf16.mxu0 %v1448_v38  ;;  %v106_v38 = vld [vmem:[%s3137_s1 + $0x228] sm:$0xff]  ;;  %v1490_v41 = vpack.c.bf16 %v103_v37, %v101_v36  ;;  %v1496_v49 = vpack.c.bf16 %v112_v47, %v110_v46  ;;  %v116_v53 = vld [vmem:[%s3137_s1 + $0x278] sm:$0xff]  ;;  %v117_v60 = vld [vmem:[%s3137_s1 + $0x280] sm:$0xff] }
  0x1b   :  { %v1492_v42 = vpack.c.bf16 %v108_v39, %v106_v38  ;;  %v1500_v55 = vpack.c.bf16 %v116_v53, %v114_v52  ;;  %v118_v58 = vld [vmem:[%s3137_s1 + $0x288] sm:$0xff]  ;;  %v120_v59 = vld [vmem:[%s3137_s1 + $0x298] sm:$0xff]  ;;  %v119_v61 = vld [vmem:[%s3137_s1 + $0x290] sm:$0xff] }
  0x1c   :  { %v124_v0 = vld [vmem:[%s3137_s1 + $0x2b8] sm:$0xff]  ;;  %v535_v1 = vld [vmem:[%s3139_s2 + $0x8] sm:$0xff]  ;;  %v534_v3 = vld [vmem:[%s3139_s2] sm:$0xff]  ;;  %v1506_v15 = vpack.c.bf16 %v119_v61, %v117_v60 }
  0x1d   :  { %1451 = vmatpush1.bf16.msra.mxu0 %v1450_v44  ;;  %v107_v44 = vld [vmem:[%s3137_s1 + $0x230] sm:$0xff]  ;;  %v537_v2 = vld [vmem:[%s3139_s2 + $0x18] sm:$0xff]  ;;  %v539_v7 = vld [vmem:[%s3139_s2 + $0x28] sm:$0xff] }
  0x1e   :  { %1453 = vmatprep.subr.bf16.mxu0 %v1452_v45  ;;  %v29_v45 = vld [vmem:[%s3138_s0 + $0x18] sm:$0xff]  ;;  %v1494_v48 = vpack.c.bf16 %v107_v44, %v105_v43  ;;  %v536_v6 = vld [vmem:[%s3139_s2 + $0x10] sm:$0xff]  ;;  %v543_v13 = vld [vmem:[%s3139_s2 + $0x48] sm:$0xff] }
  0x1f   :  { %v541_v8 = vld [vmem:[%s3139_s2 + $0x38] sm:$0xff]  ;;  %v1622_v9 = vpack.c.bf16 %v536_v6, %v534_v3  ;;  %v540_v12 = vld [vmem:[%s3139_s2 + $0x30] sm:$0xff]  ;;  %v126_v20 = vld [vmem:[%s3137_s1 + $0x2c8] sm:$0xff] }
  0x20   :  { %v545_v14 = vld [vmem:[%s3139_s2 + $0x58] sm:$0xff]  ;;  %v547_v25 = vld [vmem:[%s3139_s2 + $0x68] sm:$0xff]  ;;  %v550_v46 = vld [vmem:[%s3139_s2 + $0x80] sm:$0xff] }
  0x21   :  { %1455 = vmatpush1.bf16.msra.mxu0 %v1454_v50  ;;  %v109_v50 = vld [vmem:[%s3137_s1 + $0x240] sm:$0xff]  ;;  %v1628_v21 = vpack.c.bf16 %v545_v14, %v543_v13  ;;  %v128_v24 = vld [vmem:[%s3137_s1 + $0x2d8] sm:$0xff]  ;;  %v130_v32 = vld [vmem:[%s3137_s1 + $0x2e8] sm:$0xff] }
  0x22   :  { %1457 = vmatprep.subr.bf16.mxu0 %v1456_v51  ;;  %v111_v51 = vld [vmem:[%s3137_s1 + $0x250] sm:$0xff]  ;;  %v549_v26 = vld [vmem:[%s3139_s2 + $0x78] sm:$0xff]  ;;  %v1512_v31 = vpack.c.bf16 %v128_v24, %v126_v20  ;;  %v551_v37 = vld [vmem:[%s3139_s2 + $0x88] sm:$0xff] }
  0x23   :  { %v1498_v54 = vpack.c.bf16 %v111_v51, %v109_v50  ;;  %v1632_v33 = vpack.c.bf16 %v549_v26, %v547_v25  ;;  %v132_v36 = vld [vmem:[%s3137_s1 + $0x2f8] sm:$0xff]  ;;  %v134_v44 = vld [vmem:[%s3137_s1 + $0x308] sm:$0xff]  ;;  %v552_v47 = vld [vmem:[%s3139_s2 + $0x90] sm:$0xff] }
  0x24   :  { %v553_v38 = vld [vmem:[%s3139_s2 + $0x98] sm:$0xff]  ;;  %v1516_v43 = vpack.c.bf16 %v132_v36, %v130_v32  ;;  %v133_v52 = vld [vmem:[%s3137_s1 + $0x300] sm:$0xff]  ;;  %v135_v53 = vld [vmem:[%s3137_s1 + $0x310] sm:$0xff] }
  0x25   :  { %1459 = vmatpush1.bf16.msra.mxu0 %v1458_v56  ;;  %v113_v56 = vld [vmem:[%s3137_s1 + $0x260] sm:$0xff]  ;;  %v557_v50 = vld [vmem:[%s3139_s2 + $0xb8] sm:$0xff]  ;;  %v559_v61 = vld [vmem:[%s3139_s2 + $0xc8] sm:$0xff] }
  0x26   :  { %1461 = vmatprep.subr.bf16.mxu0 %v1460_v57  ;;  %v115_v57 = vld [vmem:[%s3137_s1 + $0x270] sm:$0xff]  ;;  %v140_v60 = vld [vmem:[%s3137_s1 + $0x338] sm:$0xff]  ;;  %v558_v6 = vld [vmem:[%s3139_s2 + $0xc0] sm:$0xff] }
  0x27   :  { %v143_v13 = vld [vmem:[%s3137_s1 + $0x350] sm:$0xff]  ;;  %v148_v20 = vld [vmem:[%s3137_s1 + $0x378] sm:$0xff]  ;;  %v145_v24 = vld [vmem:[%s3137_s1 + $0x360] sm:$0xff] }
  0x28   :  { %v147_v25 = vld [vmem:[%s3137_s1 + $0x370] sm:$0xff]  ;;  %v152_v32 = vld [vmem:[%s3137_s1 + $0x398] sm:$0xff]  ;;  %v149_v36 = vld [vmem:[%s3137_s1 + $0x380] sm:$0xff] }
  0x29   :  { %1463 = vmatpush1.bf16.msra.mxu0 %v1462_v62  ;;  %v1502_v62 = vpack.c.bf16 %v115_v57, %v113_v56  ;;  %v138_v56 = vld [vmem:[%s3137_s1 + $0x328] sm:$0xff] }
  0x2a   :  { %1465 = vmatprep.subr.bf16.mxu0 %v1464_v63  ;;  %v122_v63 = vld [vmem:[%s3137_s1 + $0x2a8] sm:$0xff]  ;;  %v1524_v3 = vpack.c.bf16 %v140_v60, %v138_v56  ;;  %v160_v56 = vld [vmem:[%s3137_s1 + $0x3d8] sm:$0xff]  ;;  %v157_v60 = vld [vmem:[%s3137_s1 + $0x3c0] sm:$0xff] }
  0x2b   :  { %v1508_v19 = vpack.c.bf16 %v124_v0, %v122_v63  ;;  %v1522_v63 = vpack.c.bf16 %v135_v53, %v133_v52  ;;  %v137_v0 = vld [vmem:[%s3137_s1 + $0x320] sm:$0xff]  ;;  %v158_v52 = vld [vmem:[%s3137_s1 + $0x3c8] sm:$0xff] }
  0x2d   :  { %1467 = vmatpush1.bf16.msra.mxu0 %v1466_v4  ;;  %v1504_v4 = vpack.c.bf16 %v120_v59, %v118_v58  ;;  %v554_v58 = vld [vmem:[%s3139_s2 + $0xa0] sm:$0xff]  ;;  %v556_v59 = vld [vmem:[%s3139_s2 + $0xb0] sm:$0xff] }
  0x2e   :  { %1469 = vmatprep.subr.bf16.mxu0 %v1468_v5  ;;  %v1620_v5 = vpack.c.bf16 %v537_v2, %v535_v1  ;;  %v139_v1 = vld [vmem:[%s3137_s1 + $0x330] sm:$0xff]  ;;  %v1642_v2 = vpack.c.bf16 %v556_v59, %v554_v58  ;;  %v581_v58 = vld [vmem:[%s3139_s2 + $0x178] sm:$0xff] }
  0x30   :  { %1621 = vmatprep.subr.bf16.mxu1 %v1620_v5 }
  0x31   :  { %1471 = vmatpush1.bf16.msra.mxu0 %v1470_v10  ;;  %v1624_v10 = vpack.c.bf16 %v541_v8, %v539_v7  ;;  %1623 = vmatpush1.bf16.msra.mxu1 %v1622_v9  ;;  %v560_v7 = vld [vmem:[%s3139_s2 + $0xd0] sm:$0xff]  ;;  %v144_v8 = vld [vmem:[%s3137_s1 + $0x358] sm:$0xff]  ;;  %v563_v9 = vld [vmem:[%s3139_s2 + $0xe8] sm:$0xff] }
  0x32   :  { %1473 = vmatprep.subr.bf16.mxu0 %v1472_v11  ;;  %v538_v11 = vld [vmem:[%s3139_s2 + $0x20] sm:$0xff]  ;;  %v1646_v14 = vpack.c.bf16 %v560_v7, %v558_v6  ;;  %v585_v6 = vld [vmem:[%s3139_s2 + $0x198] sm:$0xff] }
  0x33   :  { %v1626_v18 = vpack.c.bf16 %v540_v12, %v538_v11  ;;  %1625 = vmatprep.subr.bf16.mxu1 %v1624_v10  ;;  %v565_v10 = vld [vmem:[%s3139_s2 + $0xf8] sm:$0xff]  ;;  %v1526_v11 = vpack.c.bf16 %v139_v1, %v137_v0  ;;  %v141_v12 = vld [vmem:[%s3137_s1 + $0x340] sm:$0xff]  ;;  %v162_v0 = vld [vmem:[%s3137_s1 + $0x3e8] sm:$0xff] }
  0x35   :  { %1475 = vmatpush1.bf16.msra.mxu0 %v1474_v16  ;;  %v121_v16 = vld [vmem:[%s3137_s1 + $0x2a0] sm:$0xff]  ;;  %1627 = vmatpush1.bf16.msra.mxu1 %v1626_v18 }
  0x36   :  { %1477 = vmatprep.subr.bf16.mxu0 %v1476_v17  ;;  %v123_v17 = vld [vmem:[%s3137_s1 + $0x2b0] sm:$0xff]  ;;  %1629 = vmatprep.subr.bf16.mxu1 %v1628_v21  ;;  %v562_v18 = vld [vmem:[%s3139_s2 + $0xe0] sm:$0xff]  ;;  %v567_v21 = vld [vmem:[%s3139_s2 + $0x108] sm:$0xff] }
  0x37   :  { %v1510_v27 = vpack.c.bf16 %v123_v17, %v121_v16  ;;  %v146_v16 = vld [vmem:[%s3137_s1 + $0x368] sm:$0xff]  ;;  %v1648_v17 = vpack.c.bf16 %v565_v10, %v563_v9  ;;  %v163_v9 = vld [vmem:[%s3137_s1 + $0x3f0] sm:$0xff] }
  0x39   :  { %1479 = vmatpush1.bf16.msra.mxu0 %v1478_v22  ;;  %v542_v22 = vld [vmem:[%s3139_s2 + $0x40] sm:$0xff] }
  0x3a   :  { %1481 = vmatprep.subr.bf16.mxu0 %v1480_v23  ;;  %v544_v23 = vld [vmem:[%s3139_s2 + $0x50] sm:$0xff] }
  0x3b   :  { %v1630_v30 = vpack.c.bf16 %v544_v23, %v542_v22  ;;  %v569_v22 = vld [vmem:[%s3139_s2 + $0x118] sm:$0xff]  ;;  %v1530_v23 = vpack.c.bf16 %v143_v13, %v141_v12  ;;  %v166_v12 = vld [vmem:[%s3137_s1 + $0x408] sm:$0xff] }
  0x3d   :  { %1483 = vmatpush1.bf16.msra.mxu0 %v1482_v28  ;;  %v125_v28 = vld [vmem:[%s3137_s1 + $0x2c0] sm:$0xff]  ;;  %1631 = vmatpush1.bf16.msra.mxu1 %v1630_v30 }
  0x3e   :  { %1485 = vmatprep.subr.bf16.mxu0 %v1484_v29  ;;  %v127_v29 = vld [vmem:[%s3137_s1 + $0x2d0] sm:$0xff]  ;;  %1633 = vmatprep.subr.bf16.mxu1 %v1632_v33  ;;  %v566_v30 = vld [vmem:[%s3139_s2 + $0x100] sm:$0xff]  ;;  %v571_v33 = vld [vmem:[%s3139_s2 + $0x128] sm:$0xff] }
  0x3f   :  { %v1514_v39 = vpack.c.bf16 %v127_v29, %v125_v28  ;;  %v150_v28 = vld [vmem:[%s3137_s1 + $0x388] sm:$0xff]  ;;  %v1652_v29 = vpack.c.bf16 %v569_v22, %v567_v21  ;;  %v165_v22 = vld [vmem:[%s3137_s1 + $0x400] sm:$0xff] }
  0x41   :  { %1487 = vmatpush1.bf16.msra.mxu0 %v1486_v34  ;;  %v546_v34 = vld [vmem:[%s3139_s2 + $0x60] sm:$0xff] }
  0x42   :  { %1489 = vmatprep.subr.bf16.mxu0 %v1488_v35  ;;  %v548_v35 = vld [vmem:[%s3139_s2 + $0x70] sm:$0xff] }
  0x44   :  { %313 = vmatmul.mubr.f32.vlgmr.msra.gmra.mrb[0].mxu0 %v26_v40  ;;  %v129_v40 = vld [vmem:[%s3137_s1 + $0x2e0] sm:$0xff] }
  0x45   :  { %1491 = vmatpush1.bf16.msra.mxu0 %v1490_v41  ;;  %383 = vmatprep.mubr.f32.mxu0 %v29_v45  ;;  %v131_v41 = vld [vmem:[%s3137_s1 + $0x2f0] sm:$0xff]  ;;  %v1636_v45 = vpack.c.bf16 %v553_v38, %v551_v37 }
  0x46   :  { %1493 = vmatprep.subr.bf16.mxu0 %v1492_v42  ;;  %v1634_v42 = vpack.c.bf16 %v548_v35, %v546_v34  ;;  %v1518_v51 = vpack.c.bf16 %v131_v41, %v129_v40  ;;  %v573_v34 = vld [vmem:[%s3139_s2 + $0x138] sm:$0xff]  ;;  %v1534_v35 = vpack.c.bf16 %v147_v25, %v145_v24  ;;  %v151_v37 = vld [vmem:[%s3137_s1 + $0x390] sm:$0xff]  ;;  %v154_v40 = vld [vmem:[%s3137_s1 + $0x3a8] sm:$0xff] }
  0x47   :  { %v1656_v41 = vpack.c.bf16 %v573_v34, %v571_v33  ;;  %v170_v24 = vld [vmem:[%s3137_s1 + $0x428] sm:$0xff]  ;;  %v169_v34 = vld [vmem:[%s3137_s1 + $0x420] sm:$0xff] }
  0x48   :  { %1635 = vmatpush1.bf16.msra.mxu1 %v1634_v42  ;;  %v570_v42 = vld [vmem:[%s3139_s2 + $0x120] sm:$0xff] }
  0x49   :  { %1495 = vmatpush1.bf16.msra.mxu0 %v1494_v48  ;;  %v136_v48 = vld [vmem:[%s3137_s1 + $0x318] sm:$0xff]  ;;  %1637 = vmatprep.subr.bf16.mxu1 %v1636_v45  ;;  %v575_v45 = vld [vmem:[%s3139_s2 + $0x148] sm:$0xff] }
  0x4a   :  { %1497 = vmatprep.subr.bf16.mxu0 %v1496_v49  ;;  %v555_v49 = vld [vmem:[%s3139_s2 + $0xa8] sm:$0xff] }
  0x4b   :  { %v1640_v57 = vpack.c.bf16 %v557_v50, %v555_v49  ;;  %v155_v49 = vld [vmem:[%s3137_s1 + $0x3b0] sm:$0xff] }
  0x4d   :  { %1499 = vmatpush1.bf16.msra.mxu0 %v1498_v54  ;;  %v1638_v54 = vpack.c.bf16 %v552_v47, %v550_v46  ;;  %v577_v46 = vld [vmem:[%s3139_s2 + $0x158] sm:$0xff]  ;;  %v1538_v47 = vpack.c.bf16 %v151_v37, %v149_v36  ;;  %v31_v36 = vld [vmem:[%s3138_s0 + $0x28] sm:$0xff] }
  0x4e   :  { %1501 = vmatprep.subr.bf16.mxu0 %v1500_v55  ;;  %v1520_v55 = vpack.c.bf16 %v136_v48, %v134_v44  ;;  %v156_v44 = vld [vmem:[%s3137_s1 + $0x3b8] sm:$0xff]  ;;  %v153_v48 = vld [vmem:[%s3137_s1 + $0x3a0] sm:$0xff]  ;;  %v1660_v53 = vpack.c.bf16 %v577_v46, %v575_v45  ;;  %v178_v45 = vld [vmem:[%s3137_s1 + $0x468] sm:$0xff] }
  0x4f   :  { %1639 = vmatpush1.bf16.msra.mxu1 %v1638_v54  ;;  %v574_v54 = vld [vmem:[%s3139_s2 + $0x140] sm:$0xff]  ;;  %v1542_v59 = vpack.c.bf16 %v155_v49, %v153_v48  ;;  %v180_v46 = vld [vmem:[%s3137_s1 + $0x478] sm:$0xff] }
  0x50   :  { %1641 = vmatprep.subr.bf16.mxu1 %v1640_v57  ;;  %v579_v57 = vld [vmem:[%s3139_s2 + $0x168] sm:$0xff]  ;;  %v1564_v48 = vpack.c.bf16 %v180_v46, %v178_v45  ;;  %v177_v49 = vld [vmem:[%s3137_s1 + $0x460] sm:$0xff]  ;;  %v219_v46 = vld [vmem:[%s3137_s1 + $0x5b0] sm:$0xff] }
  0x51   :  { %1503 = vmatpush1.bf16.msra.mxu0 %v1502_v62  ;;  %v561_v62 = vld [vmem:[%s3139_s2 + $0xd8] sm:$0xff]  ;;  %v1664_v1 = vpack.c.bf16 %v581_v58, %v579_v57  ;;  %v186_v57 = vld [vmem:[%s3137_s1 + $0x4a8] sm:$0xff]  ;;  %v217_v45 = vld [vmem:[%s3137_s1 + $0x5a0] sm:$0xff] }
  0x52   :  { %1505 = vmatprep.subr.bf16.mxu0 %v1504_v4  ;;  %v142_v4 = vld [vmem:[%s3137_s1 + $0x348] sm:$0xff]  ;;  %v1644_v5 = vpack.c.bf16 %v561_v62, %v559_v61  ;;  %v159_v61 = vld [vmem:[%s3137_s1 + $0x3d0] sm:$0xff]  ;;  %v188_v58 = vld [vmem:[%s3137_s1 + $0x4b8] sm:$0xff] }
  0x53   :  { %1643 = vmatpush1.bf16.msra.mxu1 %v1642_v2  ;;  %v578_v2 = vld [vmem:[%s3139_s2 + $0x160] sm:$0xff]  ;;  %v1546_v7 = vpack.c.bf16 %v159_v61, %v157_v60  ;;  %v1572_v60 = vpack.c.bf16 %v188_v58, %v186_v57  ;;  %v227_v58 = vld [vmem:[%s3137_s1 + $0x5f0] sm:$0xff] }
  0x54   :  { %1645 = vmatprep.subr.bf16.mxu1 %v1644_v5  ;;  %v583_v5 = vld [vmem:[%s3139_s2 + $0x188] sm:$0xff]  ;;  %v185_v61 = vld [vmem:[%s3137_s1 + $0x4a0] sm:$0xff] }
  0x55   :  { %1507 = vmatpush1.bf16.msra.mxu0 %v1506_v15  ;;  %v1528_v15 = vpack.c.bf16 %v144_v8, %v142_v4  ;;  %v164_v4 = vld [vmem:[%s3137_s1 + $0x3f8] sm:$0xff]  ;;  %v161_v8 = vld [vmem:[%s3137_s1 + $0x3e0] sm:$0xff]  ;;  %v1668_v13 = vpack.c.bf16 %v585_v6, %v583_v5  ;;  %v194_v5 = vld [vmem:[%s3137_s1 + $0x4e8] sm:$0xff] }
  0x56   :  { %1509 = vmatprep.subr.bf16.mxu0 %v1508_v19  ;;  %v564_v19 = vld [vmem:[%s3139_s2 + $0xf0] sm:$0xff]  ;;  %v196_v6 = vld [vmem:[%s3137_s1 + $0x4f8] sm:$0xff]  ;;  %v225_v57 = vld [vmem:[%s3137_s1 + $0x5e0] sm:$0xff] }
  0x57   :  { %1647 = vmatpush1.bf16.msra.mxu1 %v1646_v14  ;;  %v1650_v26 = vpack.c.bf16 %v564_v19, %v562_v18  ;;  %v582_v14 = vld [vmem:[%s3139_s2 + $0x180] sm:$0xff]  ;;  %v589_v18 = vld [vmem:[%s3139_s2 + $0x1b8] sm:$0xff]  ;;  %v1550_v19 = vpack.c.bf16 %v163_v9, %v161_v8  ;;  %v1580_v8 = vpack.c.bf16 %v196_v6, %v194_v5  ;;  %v592_v6 = vld [vmem:[%s3139_s2 + $0x1d0] sm:$0xff] }
  0x58   :  { %1649 = vmatprep.subr.bf16.mxu1 %v1648_v17  ;;  %v587_v17 = vld [vmem:[%s3139_s2 + $0x1a8] sm:$0xff]  ;;  %v193_v9 = vld [vmem:[%s3137_s1 + $0x4e0] sm:$0xff] }
  0x59   :  { %1511 = vmatpush1.bf16.msra.mxu0 %v1510_v27  ;;  %v1532_v27 = vpack.c.bf16 %v148_v20, %v146_v16  ;;  %v168_v16 = vld [vmem:[%s3137_s1 + $0x418] sm:$0xff]  ;;  %v1672_v25 = vpack.c.bf16 %v589_v18, %v587_v17  ;;  %v202_v17 = vld [vmem:[%s3137_s1 + $0x528] sm:$0xff]  ;;  %v590_v5 = vld [vmem:[%s3139_s2 + $0x1c0] sm:$0xff] }
  0x5a   :  { %1513 = vmatprep.subr.bf16.mxu0 %v1512_v31  ;;  %v568_v31 = vld [vmem:[%s3139_s2 + $0x110] sm:$0xff]  ;;  %v1552_v21 = vpack.c.bf16 %v168_v16, %v166_v12  ;;  %v200_v12 = vld [vmem:[%s3137_s1 + $0x518] sm:$0xff] }
  0x5b   :  { %1651 = vmatpush1.bf16.msra.mxu1 %v1650_v26  ;;  %v1654_v38 = vpack.c.bf16 %v568_v31, %v566_v30  ;;  %v172_v26 = vld [vmem:[%s3137_s1 + $0x438] sm:$0xff]  ;;  %v28_v31 = vld [vmem:[%s3138_s0 + $0x10] sm:$0xff] }
  0x5c   :  { %1653 = vmatprep.subr.bf16.mxu1 %v1652_v29  ;;  %v591_v29 = vld [vmem:[%s3139_s2 + $0x1c8] sm:$0xff]  ;;  %v593_v30 = vld [vmem:[%s3139_s2 + $0x1d8] sm:$0xff]  ;;  %v1556_v33 = vpack.c.bf16 %v172_v26, %v170_v24  ;;  %v199_v16 = vld [vmem:[%s3137_s1 + $0x510] sm:$0xff] }
  0x5d   :  { %1515 = vmatpush1.bf16.msra.mxu0 %v1514_v39  ;;  %v1536_v39 = vpack.c.bf16 %v152_v32, %v150_v28  ;;  %v588_v28 = vld [vmem:[%s3139_s2 + $0x1b0] sm:$0xff]  ;;  %v204_v18 = vld [vmem:[%s3137_s1 + $0x538] sm:$0xff] }
  0x5e   :  { %1517 = vmatprep.subr.bf16.mxu0 %v1516_v43  ;;  %v572_v43 = vld [vmem:[%s3139_s2 + $0x130] sm:$0xff]  ;;  %v208_v24 = vld [vmem:[%s3137_s1 + $0x558] sm:$0xff] }
  0x5f   :  { %1655 = vmatpush1.bf16.msra.mxu1 %v1654_v38  ;;  %v1658_v50 = vpack.c.bf16 %v572_v43, %v570_v42  ;;  %v174_v38 = vld [vmem:[%s3137_s1 + $0x448] sm:$0xff]  ;;  %v173_v43 = vld [vmem:[%s3137_s1 + $0x440] sm:$0xff] }
  0x60   :  { %1657 = vmatprep.subr.bf16.mxu1 %v1656_v41 }
  0x61   :  { %1519 = vmatpush1.bf16.msra.mxu0 %v1518_v51  ;;  %v1540_v51 = vpack.c.bf16 %v156_v44, %v154_v40  ;;  %v1676_v40 = vpack.c.bf16 %v593_v30, %v591_v29  ;;  %v175_v44 = vld [vmem:[%s3137_s1 + $0x450] sm:$0xff]  ;;  %v210_v29 = vld [vmem:[%s3137_s1 + $0x568] sm:$0xff]  ;;  %v212_v30 = vld [vmem:[%s3137_s1 + $0x578] sm:$0xff] }
  0x62   :  { %1521 = vmatprep.subr.bf16.mxu0 %v1520_v55  ;;  %v576_v55 = vld [vmem:[%s3139_s2 + $0x150] sm:$0xff] }
  0x63   :  { %1659 = vmatpush1.bf16.msra.mxu1 %v1658_v50  ;;  %v1662_v62 = vpack.c.bf16 %v576_v55, %v574_v54  ;;  %v179_v50 = vld [vmem:[%s3137_s1 + $0x470] sm:$0xff]  ;;  %v181_v55 = vld [vmem:[%s3137_s1 + $0x480] sm:$0xff] }
  0x64   :  { %1661 = vmatprep.subr.bf16.mxu1 %v1660_v53  ;;  %v1566_v53 = vpack.c.bf16 %v179_v50, %v177_v49  ;;  %v1606_v49 = vpack.c.bf16 %v219_v46, %v217_v45 }
  0x65   :  { %1523 = vmatpush1.bf16.msra.mxu0 %v1522_v63  ;;  %v1544_v63 = vpack.c.bf16 %v160_v56, %v158_v52  ;;  %v184_v52 = vld [vmem:[%s3137_s1 + $0x498] sm:$0xff]  ;;  %v183_v56 = vld [vmem:[%s3137_s1 + $0x490] sm:$0xff] }
  0x66   :  { %1525 = vmatprep.subr.bf16.mxu0 %v1524_v3  ;;  %v580_v3 = vld [vmem:[%s3139_s2 + $0x170] sm:$0xff] }
  0x67   :  { %1663 = vmatpush1.bf16.msra.mxu1 %v1662_v62  ;;  %v1666_v10 = vpack.c.bf16 %v580_v3, %v578_v2  ;;  %v187_v62 = vld [vmem:[%s3137_s1 + $0x4b0] sm:$0xff]  ;;  %v189_v3 = vld [vmem:[%s3137_s1 + $0x4c0] sm:$0xff] }
  0x68   :  { %1665 = vmatprep.subr.bf16.mxu1 %v1664_v1  ;;  %v1574_v1 = vpack.c.bf16 %v187_v62, %v185_v61  ;;  %v1614_v61 = vpack.c.bf16 %v227_v58, %v225_v57 }
  0x69   :  { %1527 = vmatpush1.bf16.msra.mxu0 %v1526_v11  ;;  %v1548_v11 = vpack.c.bf16 %v164_v4, %v162_v0  ;;  %v192_v0 = vld [vmem:[%s3137_s1 + $0x4d8] sm:$0xff]  ;;  %v191_v4 = vld [vmem:[%s3137_s1 + $0x4d0] sm:$0xff] }
  0x6a   :  { %1529 = vmatprep.subr.bf16.mxu0 %v1528_v15  ;;  %v584_v15 = vld [vmem:[%s3139_s2 + $0x190] sm:$0xff] }
  0x6b   :  { %1667 = vmatpush1.bf16.msra.mxu1 %v1666_v10  ;;  %v1670_v20 = vpack.c.bf16 %v584_v15, %v582_v14  ;;  %v195_v10 = vld [vmem:[%s3137_s1 + $0x4f0] sm:$0xff]  ;;  %v197_v15 = vld [vmem:[%s3137_s1 + $0x500] sm:$0xff] }
  0x6c   :  { %1669 = vmatprep.subr.bf16.mxu1 %v1668_v13  ;;  %v1582_v13 = vpack.c.bf16 %v195_v10, %v193_v9  ;;  %v597_v9 = vld [vmem:[%s3139_s2 + $0x1f8] sm:$0xff] }
  0x6d   :  { %1531 = vmatpush1.bf16.msra.mxu0 %v1530_v23  ;;  %v167_v23 = vld [vmem:[%s3137_s1 + $0x410] sm:$0xff] }
  0x6e   :  { %1533 = vmatprep.subr.bf16.mxu0 %v1532_v27  ;;  %v586_v27 = vld [vmem:[%s3139_s2 + $0x1a0] sm:$0xff]  ;;  %v1554_v32 = vpack.c.bf16 %v167_v23, %v165_v22  ;;  %v203_v22 = vld [vmem:[%s3137_s1 + $0x530] sm:$0xff]  ;;  %v206_v23 = vld [vmem:[%s3137_s1 + $0x548] sm:$0xff] }
  0x6f   :  { %1671 = vmatpush1.bf16.msra.mxu1 %v1670_v20  ;;  %v1674_v37 = vpack.c.bf16 %v588_v28, %v586_v27  ;;  %v1588_v20 = vpack.c.bf16 %v204_v18, %v202_v17  ;;  %v1592_v26 = vpack.c.bf16 %v208_v24, %v206_v23  ;;  %v205_v27 = vld [vmem:[%s3137_s1 + $0x540] sm:$0xff]  ;;  %v207_v28 = vld [vmem:[%s3137_s1 + $0x550] sm:$0xff] }
  0x70   :  { %1673 = vmatprep.subr.bf16.mxu1 %v1672_v25  ;;  %v33_v17 = vld [vmem:[%s3140_s5] sm:$0x3] }
  0x71   :  { %1535 = vmatpush1.bf16.msra.mxu0 %v1534_v35  ;;  %v171_v35 = vld [vmem:[%s3137_s1 + $0x430] sm:$0xff] }
  0x72   :  { %1537 = vmatprep.subr.bf16.mxu0 %v1536_v39  ;;  %v176_v39 = vld [vmem:[%s3137_s1 + $0x458] sm:$0xff]  ;;  %v1558_v41 = vpack.c.bf16 %v171_v35, %v169_v34  ;;  %v211_v34 = vld [vmem:[%s3137_s1 + $0x570] sm:$0xff]  ;;  %v214_v35 = vld [vmem:[%s3137_s1 + $0x588] sm:$0xff] }
  0x73   :  { %v1560_v42 = vpack.c.bf16 %v176_v39, %v174_v38  ;;  %1675 = vmatpush1.bf16.msra.mxu1 %v1674_v37  ;;  %v213_v39 = vld [vmem:[%s3137_s1 + $0x580] sm:$0xff] }
  0x74   :  { %1677 = vmatprep.subr.bf16.mxu1 %v1676_v40  ;;  %v215_v40 = vld [vmem:[%s3137_s1 + $0x590] sm:$0xff] }
  0x75   :  { %1539 = vmatpush1.bf16.msra.mxu0 %v1538_v47  ;;  %v1562_v47 = vpack.c.bf16 %v175_v44, %v173_v43  ;;  %v1602_v43 = vpack.c.bf16 %v215_v40, %v213_v39 }
  0x76   :  { %1541 = vmatprep.subr.bf16.mxu0 %v1540_v51  ;;  %v182_v51 = vld [vmem:[%s3137_s1 + $0x488] sm:$0xff] }
  0x77   :  { %v1568_v54 = vpack.c.bf16 %v184_v52, %v182_v51  ;;  %v221_v51 = vld [vmem:[%s3137_s1 + $0x5c0] sm:$0xff]  ;;  %v223_v52 = vld [vmem:[%s3137_s1 + $0x5d0] sm:$0xff] }
  0x79   :  { %1543 = vmatpush1.bf16.msra.mxu0 %v1542_v59  ;;  %v1570_v59 = vpack.c.bf16 %v183_v56, %v181_v55  ;;  %v1610_v55 = vpack.c.bf16 %v223_v52, %v221_v51  ;;  %v785_v51 = vld [vmem:[%s3143_s4 + $0x40] sm:$0xff] }
  0x7a   :  { %1545 = vmatprep.subr.bf16.mxu0 %v1544_v63  ;;  %v190_v63 = vld [vmem:[%s3137_s1 + $0x4c8] sm:$0xff]  ;;  %v777_v52 = vld [vmem:[%s3143_s4] sm:$0xff] }
  0x7b   :  { %v1576_v2 = vpack.c.bf16 %v192_v0, %v190_v63  ;;  %v229_v63 = vld [vmem:[%s3137_s1 + $0x600] sm:$0xff]  ;;  %v231_v0 = vld [vmem:[%s3137_s1 + $0x610] sm:$0xff] }
  0x7d   :  { %1547 = vmatpush1.bf16.msra.mxu0 %v1546_v7  ;;  %v1578_v7 = vpack.c.bf16 %v191_v4, %v189_v3  ;;  %v1853_v3 = vmov 0.0   ;;  %v2683_v4 = vld [vmem:[%s3138_s0 + $0x30] sm:$0xff] }
  0x7e   :  { %1549 = vmatprep.subr.bf16.mxu0 %v1548_v11  ;;  %v198_v11 = vld [vmem:[%s3137_s1 + $0x508] sm:$0xff] }
  0x7f   :  { %v1584_v14 = vpack.c.bf16 %v200_v12, %v198_v11  ;;  %v594_v11 = vld [vmem:[%s3139_s2 + $0x1e0] sm:$0xff]  ;;  %v596_v12 = vld [vmem:[%s3139_s2 + $0x1f0] sm:$0xff] }
  0x81   :  { %1551 = vmatpush1.bf16.msra.mxu0 %v1550_v19  ;;  %v1586_v19 = vpack.c.bf16 %v199_v16, %v197_v15 }
  0x82   :  { %1553 = vmatprep.subr.bf16.mxu0 %v1552_v21  ;;  %v201_v21 = vld [vmem:[%s3137_s1 + $0x520] sm:$0xff] }
  0x83   :  { %v1590_v25 = vpack.c.bf16 %v203_v22, %v201_v21 }
  0x84   :  { %384 = vmatmul.mubr.f32.vlgmr.msra.gmra.mrb[0].mxu0 %v28_v31  ;;  %v1594_v31 = vpack.c.bf16 %v207_v28, %v205_v27  ;;  %v689_v27 = vld [vmem:[%s3141_s3] sm:$0xff]  ;;  %v690_v28 = vld [vmem:[%s3141_s3 + $0x8] sm:$0xff] }
  0x85   :  { %1555 = vmatpush1.bf16.msra.mxu0 %v1554_v32  ;;  %454 = vmatprep.mubr.f32.mxu0 %v31_v36  ;;  %v1596_v32 = vpack.c.bf16 %v212_v30, %v210_v29  ;;  %v216_v36 = vld [vmem:[%s3137_s1 + $0x598] sm:$0xff]  ;;  %v1685_v29 = vpack.c.bf16 %v690_v28, %v689_v27  ;;  %v1854_v30 = vmov 0.0|0.0   ;;  %v862_v27 = vld [vmem:[%s3143_s4 + $0x2a8] sm:$0xff]  ;;  %v869_v28 = vld [vmem:[%s3143_s4 + $0x2e0] sm:$0xff] }
  0x86   :  { %1557 = vmatprep.subr.bf16.mxu0 %v1556_v33  ;;  %v209_v33 = vld [vmem:[%s3137_s1 + $0x560] sm:$0xff]  ;;  %v1600_v38 = vpack.c.bf16 %v216_v36, %v214_v35 }
  0x87   :  { %v1598_v37 = vpack.c.bf16 %v211_v34, %v209_v33 }
  0x89   :  { %1559 = vmatpush1.bf16.msra.mxu0 %v1558_v41  ;;  %v218_v41 = vld [vmem:[%s3137_s1 + $0x5a8] sm:$0xff] }
  0x8a   :  { %1561 = vmatprep.subr.bf16.mxu0 %v1560_v42  ;;  %v220_v42 = vld [vmem:[%s3137_s1 + $0x5b8] sm:$0xff] }
  0x8b   :  { %v1604_v44 = vpack.c.bf16 %v220_v42, %v218_v41 }
  0x8d   :  { %1563 = vmatpush1.bf16.msra.mxu0 %v1562_v47  ;;  %v222_v47 = vld [vmem:[%s3137_s1 + $0x5c8] sm:$0xff] }
  0x8e   :  { %1565 = vmatprep.subr.bf16.mxu0 %v1564_v48  ;;  %v224_v48 = vld [vmem:[%s3137_s1 + $0x5d8] sm:$0xff] }
  0x8f   :  { %v1608_v50 = vpack.c.bf16 %v224_v48, %v222_v47 }
  0x91   :  { %1567 = vmatpush1.bf16.msra.mxu0 %v1566_v53  ;;  %v226_v53 = vld [vmem:[%s3137_s1 + $0x5e8] sm:$0xff] }
  0x92   :  { %1569 = vmatprep.subr.bf16.mxu0 %v1568_v54  ;;  %v228_v54 = vld [vmem:[%s3137_s1 + $0x5f8] sm:$0xff] }
  0x93   :  { %v1612_v56 = vpack.c.bf16 %v228_v54, %v226_v53  ;;  %v784_v54 = vld [vmem:[%s3143_s4 + $0x38] sm:$0xff] }
  0x94   :  { %v1689_v57 = vpack.c.bf16 %v784_v54, %v777_v52 }
  0x95   :  { %1571 = vmatpush1.bf16.msra.mxu0 %v1570_v59  ;;  %v230_v59 = vld [vmem:[%s3137_s1 + $0x608] sm:$0xff] }
  0x96   :  { %1573 = vmatprep.subr.bf16.mxu0 %v1572_v60  ;;  %v232_v60 = vld [vmem:[%s3137_s1 + $0x618] sm:$0xff] }
  0x97   :  { %v1616_v62 = vpack.c.bf16 %v232_v60, %v230_v59  ;;  %v791_v59 = vld [vmem:[%s3143_s4 + $0x70] sm:$0xff]  ;;  %v798_v60 = vld [vmem:[%s3143_s4 + $0xa8] sm:$0xff] }
  0x99   :  { %1575 = vmatpush1.bf16.msra.mxu0 %v1574_v1  ;;  %v2676_v1 = vld [vmem:[%s3138_s0 + $0x20] sm:$0xff] }
  0x9a   :  { %1577 = vmatprep.subr.bf16.mxu0 %v1576_v2  ;;  %v1618_v2 = vpack.c.bf16 %v231_v0, %v229_v63  ;;  %v1693_v63 = vpack.c.bf16 %v798_v60, %v791_v59 }
  0x9d   :  { %1579 = vmatpush1.bf16.msra.mxu0 %v1578_v7  ;;  %v1678_v7 = vpack.c.bf16 %v592_v6, %v590_v5  ;;  %v812_v5 = vld [vmem:[%s3143_s4 + $0x118] sm:$0xff] }
  0x9e   :  { %1581 = vmatprep.subr.bf16.mxu0 %v1580_v8  ;;  %v595_v8 = vld [vmem:[%s3139_s2 + $0x1e8] sm:$0xff]  ;;  %v820_v6 = vld [vmem:[%s3143_s4 + $0x158] sm:$0xff] }
  0x9f   :  { %1679 = vmatpush1.bf16.msra.mxu1 %v1678_v7  ;;  %v1680_v10 = vpack.c.bf16 %v597_v9, %v595_v8  ;;  %v827_v7 = vld [vmem:[%s3143_s4 + $0x190] sm:$0xff] }
  0xa0   :  { %v1699_v9 = vpack.c.bf16 %v827_v7, %v820_v6  ;;  %v821_v6 = vld [vmem:[%s3143_s4 + $0x160] sm:$0xff]  ;;  %v828_v7 = vld [vmem:[%s3143_s4 + $0x198] sm:$0xff] }
  0xa1   :  { %1583 = vmatpush1.bf16.msra.mxu0 %v1582_v13  ;;  %v1682_v13 = vpack.c.bf16 %v596_v12, %v594_v11  ;;  %1681 = vmatprep.subr.bf16.mxu1 %v1680_v10  ;;  %v819_v10 = vld [vmem:[%s3143_s4 + $0x150] sm:$0xff]  ;;  %v826_v11 = vld [vmem:[%s3143_s4 + $0x188] sm:$0xff] }
  0xa2   :  { %1585 = vmatprep.subr.bf16.mxu0 %v1584_v14  ;;  %v234_v14 = vlaneseq  ;;  %v834_v12 = vld [vmem:[%s3143_s4 + $0x1c8] sm:$0xff] }
  0xa3   :  { %1683 = vmatpush1.bf16.msra.mxu1 %v1682_v13  ;;  %v841_v13 = vld [vmem:[%s3143_s4 + $0x200] sm:$0xff] }
  0xa4   :  { %v2705_v15 = vshrl.u32 %v234_v14, 7  ;;  %1684 = vmatprep.subr.bf16.mxu1 %v1854_v30  ;;  %v1701_v14 = vpack.c.bf16 %v826_v11, %v819_v10  ;;  %v1733_v10 = vpack.c.bf16 %v828_v7, %v821_v6  ;;  %v852_v6 = vld [vmem:[%s3143_s4 + $0x258] sm:$0xff]  ;;  %v859_v7 = vld [vmem:[%s3143_s4 + $0x290] sm:$0xff] }
  0xa5   :  { %1587 = vmatpush1.bf16.msra.mxu0 %v1586_v19 }
  0xa6   :  { %1589 = vmatprep.subr.bf16.mxu0 %v1588_v20  ;;  %v2708_v16 = vsub.s32 0, %v2705_v15  ;;  %v2714_v18 = vsub.s32 1, %v2705_v15 }
  0xa8   :  { %v237_v19 = vrot.slane %v33_v17, %v2708_v16  ;;  %v241_v20 = vrot.slane %v33_v17, %v2714_v18  ;;  %v1703_v17 = vpack.c.bf16 %v841_v13, %v834_v12  ;;  %v835_v12 = vld [vmem:[%s3143_s4 + $0x1d0] sm:$0xff]  ;;  %v842_v13 = vld [vmem:[%s3143_s4 + $0x208] sm:$0xff] }
  0xa9   :  { %1591 = vmatpush1.bf16.msra.mxu0 %v1590_v25 }
  0xaa   :  { %1593 = vmatprep.subr.bf16.mxu0 %v1592_v26 }
  0xad   :  { %1595 = vmatpush1.bf16.msra.mxu0 %v1594_v31  ;;  %v691_v31 = vld [vmem:[%s3141_s3 + $0x10] sm:$0xf] }
  0xae   :  { %1597 = vmatprep.subr.bf16.mxu0 %v1596_v32  ;;  %v34_v32 = vld [vmem:[%s3140_s5 + $0x2] sm:$0x3] }
  0xaf   :  { %v606_v33 = vrot.slane %v34_v32, %v2714_v18  ;;  %v602_v34 = vrot.slane %v34_v32, %v2708_v16  ;;  %v861_v32 = vld [vmem:[%s3143_s4 + $0x2a0] sm:$0xff] }
  0xb1   :  { %1599 = vmatpush1.bf16.msra.mxu0 %v1598_v37  ;;  %v1355_v37 = vld [vmem:[%s3142_s6] ss:$0 sm:$0xff] }
  0xb2   :  { %1601 = vmatprep.subr.bf16.mxu0 %v1600_v38 }
  0xb5   :  { %1603 = vmatpush1.bf16.msra.mxu0 %v1602_v43 }
  0xb6   :  { %1605 = vmatprep.subr.bf16.mxu0 %v1604_v44 }
  0xb9   :  { %1607 = vmatpush1.bf16.msra.mxu0 %v1606_v49 }
  0xba   :  { %1609 = vmatprep.subr.bf16.mxu0 %v1608_v50  ;;  %v778_v50 = vld [vmem:[%s3143_s4 + $0x8] sm:$0xff] }
  0xbb   :  { %v1687_v53 = vpack.c.bf16 %v785_v51, %v778_v50 }
  0xbd   :  { %1611 = vmatpush1.bf16.msra.mxu0 %v1610_v55  ;;  %v792_v55 = vld [vmem:[%s3143_s4 + $0x78] sm:$0xff] }
  0xbe   :  { %1613 = vmatprep.subr.bf16.mxu0 %v1612_v56  ;;  %v799_v56 = vld [vmem:[%s3143_s4 + $0xb0] sm:$0xff] }
  0xbf   :  { %v1691_v58 = vpack.c.bf16 %v799_v56, %v792_v55  ;;  %v793_v55 = vld [vmem:[%s3143_s4 + $0x80] sm:$0xff]  ;;  %v800_v56 = vld [vmem:[%s3143_s4 + $0xb8] sm:$0xff] }
  0xc0   :  { %v1725_v59 = vpack.c.bf16 %v800_v56, %v793_v55  ;;  %v824_v55 = vld [vmem:[%s3143_s4 + $0x178] sm:$0xff]  ;;  %v831_v56 = vld [vmem:[%s3143_s4 + $0x1b0] sm:$0xff] }
  0xc1   :  { %1615 = vmatpush1.bf16.msra.mxu0 %v1614_v61  ;;  %v806_v61 = vld [vmem:[%s3143_s4 + $0xe8] sm:$0xff] }
  0xc2   :  { %1617 = vmatprep.subr.bf16.mxu0 %v1616_v62  ;;  %v813_v62 = vld [vmem:[%s3143_s4 + $0x120] sm:$0xff] }
  0xc3   :  { %v1695_v0 = vpack.c.bf16 %v813_v62, %v806_v61  ;;  %v807_v61 = vld [vmem:[%s3143_s4 + $0xf0] sm:$0xff]  ;;  %v814_v62 = vld [vmem:[%s3143_s4 + $0x128] sm:$0xff] }
  0xc4   :  { %455 = vmatmul.mubr.f32.vlgmr.msra.gmra.mrb[0].mxu0 %v2676_v1 }
  0xc5   :  { %1619 = vmatpush1.bf16.msra.mxu0 %v1618_v2  ;;  %525 = vmatprep.mubr.f32.mxu0 %v1853_v3  ;;  %v805_v2 = vld [vmem:[%s3143_s4 + $0xe0] sm:$0xff] }
  0xc6   :  { %v1697_v8 = vpack.c.bf16 %v812_v5, %v805_v2  ;;  %v1729_v2 = vpack.c.bf16 %v814_v62, %v807_v61  ;;  %v838_v61 = vld [vmem:[%s3143_s4 + $0x1e8] sm:$0xff]  ;;  %v845_v62 = vld [vmem:[%s3143_s4 + $0x220] sm:$0xff] }
  0xcc   :  { %1354 = vmatmul.mubr.msk.f32.vlgmr.msra.gmra.mrb[0].mxu0 %vm244_vm0, %v2683_v4 }
 0x19f   :  { %v527_v21 = vpop.f32.mrb[0].mxu0 }
 0x1a0   :  { %v1807_v22 = vadd.f32 %v527_v21, %v237_v19  ;;  %v529_v23 = vpop.f32.mrb[1].mxu0  ;;  %v833_v19 = vld [vmem:[%s3143_s4 + $0x1c0] sm:$0xff]  ;;  %v848_v21 = vld [vmem:[%s3143_s4 + $0x238] sm:$0xff] }
 0x1a1   :  { %v1808_v24 = vadd.f32 %v529_v23, %v241_v20  ;;  %v840_v20 = vld [vmem:[%s3143_s4 + $0x1f8] sm:$0xff] }
 0x1a2   :  { %v532_v26 = vmax.f32 %v1807_v22, 0.0  ;;  %v855_v22 = vld [vmem:[%s3143_s4 + $0x270] sm:$0xff]  ;;  %v1705_v23 = vpack.c.bf16 %v840_v20, %v833_v19  ;;  %v1737_v19 = vpack.c.bf16 %v842_v13, %v835_v12  ;;  %v866_v12 = vld [vmem:[%s3143_s4 + $0x2c8] sm:$0xff]  ;;  %v873_v13 = vld [vmem:[%s3143_s4 + $0x300] sm:$0xff] }
 0x1a3   :  { %v533_v25 = vmax.f32 %v1808_v24, 0.0  ;;  %v1707_v24 = vpack.c.bf16 %v855_v22, %v848_v21  ;;  %v849_v21 = vld [vmem:[%s3143_s4 + $0x240] sm:$0xff]  ;;  %v856_v22 = vld [vmem:[%s3143_s4 + $0x278] sm:$0xff] }
 0x1a5   :  { %673 = vmatprep.mubr.f32.mxu1 %v533_v25  ;;  %v847_v25 = vld [vmem:[%s3143_s4 + $0x230] sm:$0xff] }
 0x1a6   :  { %674 = vmatmul.mubr.f32.vlgmr.msra.gmra.mrb[0].mxu1 %v532_v26  ;;  %v854_v26 = vld [vmem:[%s3143_s4 + $0x268] sm:$0xff] }
 0x1a7   :  { %1686 = vmatpush3.bf16.msra.mxu1 %v1685_v29  ;;  %1386 = vmatprep.mubr.msk.f32.mxu1 %vm1855_vm2, %v1853_v3  ;;  %v1709_v29 = vpack.c.bf16 %v854_v26, %v847_v25  ;;  %v1741_v25 = vpack.c.bf16 %v856_v22, %v849_v21  ;;  %v880_v21 = vld [vmem:[%s3143_s4 + $0x338] sm:$0xff]  ;;  %v887_v22 = vld [vmem:[%s3143_s4 + $0x370] sm:$0xff] }
 0x1a8   :  { %1384 = vmatprep.subr.mxu1 %v1853_v3 }
 0x1ab   :  { %1385 = vmatpush3.msk.msra.mxu1 %vm702_vm1, %v691_v31  ;;  %v1711_v31 = vpack.c.bf16 %v869_v28, %v862_v27  ;;  %v863_v27 = vld [vmem:[%s3143_s4 + $0x2b0] sm:$0xff]  ;;  %v870_v28 = vld [vmem:[%s3143_s4 + $0x2e8] sm:$0xff] }
 0x1ac   :  { %1688 = vmatprep.subr.bf16.mxu1 %v1687_v53 }
 0x279   :  { %v675_v35 = vpop.f32.mrb[0].mxu1 }
 0x27a   :  { %v677_v36 = vpop.f32.mrb[1].mxu1  ;;  %v676_v39 = vadd.f32 %v675_v35, %v602_v34  ;;  %v876_v35 = vld [vmem:[%s3143_s4 + $0x318] sm:$0xff] }
 0x27b   :  { %v678_v38 = vadd.f32 %v677_v36, %v606_v33  ;;  %v868_v33 = vld [vmem:[%s3143_s4 + $0x2d8] sm:$0xff]  ;;  %v883_v36 = vld [vmem:[%s3143_s4 + $0x350] sm:$0xff] }
 0x27c   :  { %v1340_v45 = vmul.f32 %v676_v39, %v676_v39  ;;  %v1713_v34 = vpack.c.bf16 %v868_v33, %v861_v32  ;;  %v1745_v32 = vpack.c.bf16 %v870_v28, %v863_v27  ;;  %v783_v28 = vld [vmem:[%s3143_s4 + $0x30] sm:$0xff] }
 0x27d   :  { %v687_v40 = vmul.f32 %v1355_v37, %v678_v38  ;;  %v1336_v41 = vmul.f32 %v678_v38, %v678_v38  ;;  %v1715_v37 = vpack.c.bf16 %v883_v36, %v876_v35  ;;  %v875_v38 = vld [vmem:[%s3143_s4 + $0x310] sm:$0xff]  ;;  %v884_v35 = vld [vmem:[%s3143_s4 + $0x358] sm:$0xff]  ;;  %v782_v36 = vld [vmem:[%s3143_s4 + $0x28] sm:$0xff] }
 0x27f   :  { %v688_v42 = vadd.f32 %v687_v40, %v676_v39  ;;  %1818 = vlog2.f32 %v1336_v41  ;;  %v882_v39 = vld [vmem:[%s3143_s4 + $0x348] sm:$0xff] }
 0x280   :  { %v1717_v40 = vpack.c.bf16 %v882_v39, %v875_v38 }
 0x281   :  { %1387 = vmatmul.mubr.msk.f32.vlgmr.msra.gmra.mrb[2].mxu1 %vm698_vm3, %v688_v42  ;;  %v787_v42 = vld [vmem:[%s3143_s4 + $0x50] sm:$0xff] }
 0x282   :  { %989 = vmatprep.mubr.f32.mxu1 %v1853_v3  ;;  %1690 = vmatpush1.bf16.msra.mxu1 %v1689_v57  ;;  %v808_v57 = vld [vmem:[%s3143_s4 + $0xf8] sm:$0xff] }
 0x283   :  { %1692 = vmatprep.subr.bf16.mxu1 %v1691_v58  ;;  %v815_v58 = vld [vmem:[%s3143_s4 + $0x130] sm:$0xff] }
 0x284   :  { %v1727_v60 = vpack.c.bf16 %v815_v58, %v808_v57  ;;  %v1763_v58 = vpack.c.bf16 %v831_v56, %v824_v55 }
 0x286   :  { %1694 = vmatpush1.bf16.msra.mxu1 %v1693_v63  ;;  %v822_v63 = vld [vmem:[%s3143_s4 + $0x168] sm:$0xff] }
 0x287   :  { %1696 = vmatprep.subr.bf16.mxu1 %v1695_v0  ;;  %v829_v0 = vld [vmem:[%s3143_s4 + $0x1a0] sm:$0xff] }
 0x288   :  { %v1731_v5 = vpack.c.bf16 %v829_v0, %v822_v63  ;;  %v1767_v0 = vpack.c.bf16 %v845_v62, %v838_v61 }
 0x289   :  { %v1819_v43 = vpop.eup %1818 }
 0x28a   :  { %v1338_v44 = vmul.f32 0.6931472, %v1819_v43  ;;  %1698 = vmatpush1.bf16.msra.mxu1 %v1697_v8  ;;  %v836_v8 = vld [vmem:[%s3143_s4 + $0x1d8] sm:$0xff] }
 0x28b   :  { %1700 = vmatprep.subr.bf16.mxu1 %v1699_v9  ;;  %v843_v9 = vld [vmem:[%s3143_s4 + $0x210] sm:$0xff] }
 0x28c   :  { %v1339_v46 = vadd.f32 1.0, %v1338_v44  ;;  %v1356_v44 = vld [vmem:[%s3140_s5 + $0x4] ss:$0 sm:$0xff]  ;;  %v1735_v11 = vpack.c.bf16 %v843_v9, %v836_v8  ;;  %v1771_v9 = vpack.c.bf16 %v859_v7, %v852_v6 }
 0x28e   :  { %v1341_v47 = vsub.f32 %v1339_v46, %v1340_v45  ;;  %1702 = vmatpush1.bf16.msra.mxu1 %v1701_v14  ;;  %v779_v45 = vld [vmem:[%s3143_s4 + $0x10] sm:$0xff]  ;;  %v786_v46 = vld [vmem:[%s3143_s4 + $0x48] sm:$0xff] }
 0x28f   :  { %1704 = vmatprep.subr.bf16.mxu1 %v1703_v17  ;;  %v1721_v52 = vpack.c.bf16 %v786_v46, %v779_v45  ;;  %v850_v14 = vld [vmem:[%s3143_s4 + $0x248] sm:$0xff]  ;;  %v857_v17 = vld [vmem:[%s3143_s4 + $0x280] sm:$0xff]  ;;  %v795_v46 = vld [vmem:[%s3143_s4 + $0x90] sm:$0xff] }
 0x290   :  { %v1342_v48 = vsub.f32 %v1341_v47, %v1336_v41  ;;  %v780_v41 = vld [vmem:[%s3143_s4 + $0x18] sm:$0xff]  ;;  %v1739_v20 = vpack.c.bf16 %v857_v17, %v850_v14  ;;  %v1775_v17 = vpack.c.bf16 %v873_v13, %v866_v12 }
 0x291   :  { %v1719_v43 = vpack.c.bf16 %v787_v42, %v780_v41  ;;  %v788_v41 = vld [vmem:[%s3143_s4 + $0x58] sm:$0xff] }
 0x292   :  { %v1343_v49 = vsel %vm698_vm3, %v1342_v48, 0.0  ;;  %1706 = vmatpush1.bf16.msra.mxu1 %v1705_v23  ;;  %v794_v48 = vld [vmem:[%s3143_s4 + $0x88] sm:$0xff]  ;;  %v864_v23 = vld [vmem:[%s3143_s4 + $0x2b8] sm:$0xff] }
 0x293   :  { %1344 = vadd.xlane.f32.xlu0 %v1343_v49  ;;  %1708 = vmatprep.subr.bf16.mxu1 %v1707_v24  ;;  %v801_v49 = vld [vmem:[%s3143_s4 + $0xc0] sm:$0xff]  ;;  %v871_v24 = vld [vmem:[%s3143_s4 + $0x2f0] sm:$0xff]  ;;  %v796_v42 = vld [vmem:[%s3143_s4 + $0x98] sm:$0xff] }
 0x294   :  { %v1723_v54 = vpack.c.bf16 %v801_v49, %v794_v48  ;;  %v1743_v26 = vpack.c.bf16 %v871_v24, %v864_v23  ;;  %v810_v48 = vld [vmem:[%s3143_s4 + $0x108] sm:$0xff]  ;;  %v817_v49 = vld [vmem:[%s3143_s4 + $0x140] sm:$0xff]  ;;  %v1779_v24 = vpack.c.bf16 %v887_v22, %v880_v21 }
 0x295   :  { %v1849_v21 = vld [vmem:[%s3138_s0 + $0x8] sm:$0xff] }
 0x296   :  { %1710 = vmatpush1.bf16.msra.mxu1 %v1709_v29  ;;  %v878_v29 = vld [vmem:[%s3143_s4 + $0x328] sm:$0xff] }
 0x297   :  { %1712 = vmatprep.subr.bf16.mxu1 %v1711_v31  ;;  %v885_v31 = vld [vmem:[%s3143_s4 + $0x360] sm:$0xff] }
 0x298   :  { %v1747_v33 = vpack.c.bf16 %v885_v31, %v878_v29  ;;  %v790_v29 = vld [vmem:[%s3143_s4 + $0x68] sm:$0xff] }
 0x299   :  { %v1784_v31 = vpack.c.bf16 %v790_v29, %v783_v28 }
 0x29a   :  { %1714 = vmatpush1.bf16.msra.mxu1 %v1713_v34  ;;  %v877_v34 = vld [vmem:[%s3143_s4 + $0x320] sm:$0xff] }
 0x29b   :  { %1716 = vmatprep.subr.bf16.mxu1 %v1715_v37  ;;  %v789_v37 = vld [vmem:[%s3143_s4 + $0x60] sm:$0xff]  ;;  %v1749_v38 = vpack.c.bf16 %v884_v35, %v877_v34  ;;  %v811_v35 = vld [vmem:[%s3143_s4 + $0x110] sm:$0xff] }
 0x29c   :  { %v1751_v39 = vpack.c.bf16 %v789_v37, %v782_v36  ;;  %v818_v36 = vld [vmem:[%s3143_s4 + $0x148] sm:$0xff] }
 0x29d   :  { %v1790_v37 = vpack.c.bf16 %v818_v36, %v811_v35 }
 0x29e   :  { %1718 = vmatpush1.bf16.msra.mxu1 %v1717_v40  ;;  %v781_v40 = vld [vmem:[%s3143_s4 + $0x20] sm:$0xff] }
 0x29f   :  { %1720 = vmatprep.subr.bf16.mxu1 %v1719_v43  ;;  %v803_v43 = vld [vmem:[%s3143_s4 + $0xd0] sm:$0xff] }
 0x2a0   :  { %v1755_v45 = vpack.c.bf16 %v803_v43, %v796_v42  ;;  %v853_v43 = vld [vmem:[%s3143_s4 + $0x260] sm:$0xff] }
 0x354   :  { %v772_v47 = vpop.f32.mrb[2].mxu1 }
 0x355   :  { %v773_v50 = vadd.f32 %v1356_v44, %v772_v47  ;;  %v1388_v51 = vpop.f32.mrb[3].mxu1  ;;  %v1753_v44 = vpack.c.bf16 %v788_v41, %v781_v40  ;;  %v802_v47 = vld [vmem:[%s3143_s4 + $0xc8] sm:$0xff]  ;;  %v839_v40 = vld [vmem:[%s3143_s4 + $0x1f0] sm:$0xff] }
 0x356   :  { %v1759_v51 = vpack.c.bf16 %v817_v49, %v810_v48  ;;  %v846_v41 = vld [vmem:[%s3143_s4 + $0x228] sm:$0xff]  ;;  %v881_v49 = vld [vmem:[%s3143_s4 + $0x340] sm:$0xff] }
 0x357   :  { %v2857_v53 = vmax.f32 %v773_v50, 0.0  ;;  %v1757_v50 = vpack.c.bf16 %v802_v47, %v795_v46  ;;  %v1796_v42 = vpack.c.bf16 %v846_v41, %v839_v40  ;;  %v867_v46 = vld [vmem:[%s3143_s4 + $0x2d0] sm:$0xff]  ;;  %v874_v47 = vld [vmem:[%s3143_s4 + $0x308] sm:$0xff] }
 0x358   :  { %v1802_v48 = vpack.c.bf16 %v874_v47, %v867_v46 }
 0x359   :  { %990 = vmatmul.mubr.f32.vlgmr.msra.gmra.mrb[4].mxu1 %v2857_v53 }
 0x35a   :  { %1722 = vmatpush1.bf16.msra.mxu1 %v1721_v52  ;;  %1060 = vmatprep.mubr.f32.mxu1 %v1853_v3  ;;  %v809_v52 = vld [vmem:[%s3143_s4 + $0x100] sm:$0xff] }
 0x35b   :  { %1724 = vmatprep.subr.bf16.mxu1 %v1723_v54  ;;  %v816_v54 = vld [vmem:[%s3143_s4 + $0x138] sm:$0xff] }
 0x35c   :  { %v1761_v57 = vpack.c.bf16 %v816_v54, %v809_v52  ;;  %v3100_v52 = vld [vmem:[%s3140_s5 + $0x5] sm:$0x7f] }
 0x35d   :  { %v893_v54 = vrot.slane %v3100_v52, %v2708_v16  ;;  %v897_v55 = vrot.slane %v3100_v52, %v2714_v18  ;;  %v900_v18 = vsub.s32 2, %v2705_v15 }
 0x35e   :  { %1726 = vmatpush1.bf16.msra.mxu1 %v1725_v59  ;;  %v823_v59 = vld [vmem:[%s3143_s4 + $0x170] sm:$0xff] }
 0x35f   :  { %1728 = vmatprep.subr.bf16.mxu1 %v1727_v60  ;;  %v830_v60 = vld [vmem:[%s3143_s4 + $0x1a8] sm:$0xff]  ;;  %v901_v13 = vrot.slane %v3100_v52, %v900_v18 }
 0x360   :  { %v1765_v63 = vpack.c.bf16 %v830_v60, %v823_v59 }
 0x362   :  { %1730 = vmatpush1.bf16.msra.mxu1 %v1729_v2  ;;  %v837_v2 = vld [vmem:[%s3143_s4 + $0x1e0] sm:$0xff] }
 0x363   :  { %1732 = vmatprep.subr.bf16.mxu1 %v1731_v5  ;;  %v844_v5 = vld [vmem:[%s3143_s4 + $0x218] sm:$0xff] }
 0x364   :  { %v1769_v8 = vpack.c.bf16 %v844_v5, %v837_v2 }
 0x366   :  { %1734 = vmatpush1.bf16.msra.mxu1 %v1733_v10  ;;  %v851_v10 = vld [vmem:[%s3143_s4 + $0x250] sm:$0xff] }
 0x367   :  { %1736 = vmatprep.subr.bf16.mxu1 %v1735_v11  ;;  %v858_v11 = vld [vmem:[%s3143_s4 + $0x288] sm:$0xff] }
 0x368   :  { %v1773_v14 = vpack.c.bf16 %v858_v11, %v851_v10  ;;  %v1848_v10 = vld [vmem:[%s3138_s0] sm:$0xff] }
 0x36a   :  { %1738 = vmatpush1.bf16.msra.mxu1 %v1737_v19  ;;  %v865_v19 = vld [vmem:[%s3143_s4 + $0x2c0] sm:$0xff] }
 0x36b   :  { %1740 = vmatprep.subr.bf16.mxu1 %v1739_v20  ;;  %v872_v20 = vld [vmem:[%s3143_s4 + $0x2f8] sm:$0xff] }
 0x36c   :  { %v1777_v23 = vpack.c.bf16 %v872_v20, %v865_v19 }
 0x36e   :  { %1742 = vmatpush1.bf16.msra.mxu1 %v1741_v25  ;;  %v879_v25 = vld [vmem:[%s3143_s4 + $0x330] sm:$0xff] }
 0x36f   :  { %1744 = vmatprep.subr.bf16.mxu1 %v1743_v26  ;;  %v886_v26 = vld [vmem:[%s3143_s4 + $0x368] sm:$0xff] }
 0x370   :  { %v1781_v27 = vpack.c.bf16 %v886_v26, %v879_v25 }
 0x372   :  { %1746 = vmatpush1.bf16.msra.mxu1 %v1745_v32  ;;  %v797_v32 = vld [vmem:[%s3143_s4 + $0xa0] sm:$0xff] }
 0x373   :  { %1748 = vmatprep.subr.bf16.mxu1 %v1747_v33  ;;  %v804_v33 = vld [vmem:[%s3143_s4 + $0xd8] sm:$0xff] }
 0x374   :  { %v1787_v34 = vpack.c.bf16 %v804_v33, %v797_v32 }
 0x376   :  { %1750 = vmatpush1.bf16.msra.mxu1 %v1749_v38  ;;  %v825_v38 = vld [vmem:[%s3143_s4 + $0x180] sm:$0xff] }
 0x377   :  { %1752 = vmatprep.subr.bf16.mxu1 %v1751_v39 }
 0x379   :  { %1061 = vmatmul.mubr.f32.vlgmr.msra.gmra.mrb[6].mxu1 %v2857_v53 }
 0x37a   :  { %1754 = vmatpush1.bf16.msra.mxu1 %v1753_v44  ;;  %1131 = vmatprep.mubr.f32.mxu1 %v1853_v3  ;;  %v860_v44 = vld [vmem:[%s3143_s4 + $0x298] sm:$0xff] }
 0x37b   :  { %1756 = vmatprep.subr.bf16.mxu1 %v1755_v45  ;;  %v1799_v45 = vpack.c.bf16 %v860_v44, %v853_v43 }
 0x37e   :  { %1758 = vmatpush1.bf16.msra.mxu1 %v1757_v50  ;;  %v888_v50 = vld [vmem:[%s3143_s4 + $0x378] sm:$0xff] }
 0x37f   :  { %1760 = vmatprep.subr.bf16.mxu1 %v1759_v51  ;;  %v1805_v51 = vpack.c.bf16 %v888_v50, %v881_v49 }
 0x382   :  { %1762 = vmatpush1.bf16.msra.mxu1 %v1761_v57 }
 0x383   :  { %1764 = vmatprep.subr.bf16.mxu1 %v1763_v58 }
 0x386   :  { %1766 = vmatpush1.bf16.msra.mxu1 %v1765_v63 }
 0x387   :  { %1768 = vmatprep.subr.bf16.mxu1 %v1767_v0 }
 0x38a   :  { %1770 = vmatpush1.bf16.msra.mxu1 %v1769_v8  ;;  %v904_v8 = vsub.s32 3, %v2705_v15 }
 0x38b   :  { %1772 = vmatprep.subr.bf16.mxu1 %v1771_v9 }
 0x38c   :  { %v905_v19 = vrot.slane %v3100_v52, %v904_v8 }
 0x38e   :  { %1774 = vmatpush1.bf16.msra.mxu1 %v1773_v14 }
 0x38f   :  { %1776 = vmatprep.subr.bf16.mxu1 %v1775_v17 }
 0x392   :  { %1778 = vmatpush1.bf16.msra.mxu1 %v1777_v23 }
 0x393   :  { %1780 = vmatprep.subr.bf16.mxu1 %v1779_v24 }
 0x396   :  { %1782 = vmatpush1.bf16.msra.mxu1 %v1781_v27 }
 0x397   :  { %1783 = vmatprep.subr.bf16.mxu1 %v1854_v30 }
 0x399   :  { %1132 = vmatmul.mubr.f32.vlgmr.msra.gmra.mrb[8].mxu1 %v2857_v53 }
 0x39a   :  { %1785 = vmatpush3.bf16.msra.mxu1 %v1784_v31  ;;  %1421 = vmatprep.mubr.msk.f32.mxu1 %vm1855_vm2, %v1853_v3  ;;  %v832_v3 = vld [vmem:[%s3143_s4 + $0x1b8] sm:$0xff] }
 0x39b   :  { %1786 = vmatprep.subr.bf16.mxu1 %v1854_v30  ;;  %v1793_v39 = vpack.c.bf16 %v832_v3, %v825_v38 }
 0x39e   :  { %1788 = vmatpush3.bf16.msra.mxu1 %v1787_v34 }
 0x39f   :  { %1789 = vmatprep.subr.bf16.mxu1 %v1854_v30 }
 0x3a2   :  { %1791 = vmatpush3.bf16.msra.mxu1 %v1790_v37 }
 0x3a3   :  { %1792 = vmatprep.subr.bf16.mxu1 %v1854_v30 }
 0x3a6   :  { %1794 = vmatpush3.bf16.msra.mxu1 %v1793_v39 }
 0x3a7   :  { %1795 = vmatprep.subr.bf16.mxu1 %v1854_v30 }
 0x3aa   :  { %1797 = vmatpush3.bf16.msra.mxu1 %v1796_v42 }
 0x3ab   :  { %1798 = vmatprep.subr.bf16.mxu1 %v1854_v30 }
 0x3ae   :  { %1800 = vmatpush3.bf16.msra.mxu1 %v1799_v45 }
 0x3af   :  { %1801 = vmatprep.subr.bf16.mxu1 %v1854_v30 }
 0x3b2   :  { %1803 = vmatpush3.bf16.msra.mxu1 %v1802_v48 }
 0x3b3   :  { %1804 = vmatprep.subr.bf16.mxu1 %v1854_v30 }
 0x3b6   :  { %1806 = vmatpush3.bf16.msra.mxu1 %v1805_v51 }
 0x3b9   :  { %1422 = vmatmul.mubr.f32.vlgmr.msra.gmra.mrb[10].mxu1 %v2857_v53 }
 0x42c   :  { %v991_v56 = vpop.f32.mrb[4].mxu1 }
 0x42d   :  { %v992_v57 = vadd.f32 %v991_v56, %v893_v54  ;;  %v993_v58 = vpop.f32.mrb[5].mxu1  ;;  %v908_v54 = vsub.s32 4, %v2705_v15 }
 0x42e   :  { %v994_v59 = vadd.f32 %v993_v58, %v897_v55  ;;  %v912_v55 = vsub.s32 5, %v2705_v15 }
 0x42f   :  { %v1229_v60 = vand.u32 2147483647, %v992_v57  ;;  %v1208_v9 = vmax.f32 %v992_v57, 0.0  ;;  %v1215_v11 = vmul.f32 %v1848_v10, %v992_v57  ;;  %v909_v58 = vrot.slane %v3100_v52, %v908_v54 }
 0x430   :  { %v1230_v30 = vand.u32 2147483647, %v994_v59  ;;  %v1209_v20 = vmax.f32 %v994_v59, 0.0  ;;  %v1216_v22 = vmul.f32 %v1849_v21, %v994_v59 }
 0x431   :  { %v1236_v61 = vsub.f32 0.0, %v1229_v60  ;;  %v1222_v27 = vsub.f32 %v1208_v9, %v1215_v11  ;;  %v1850_v60 = vld [vmem:[%s3138_s0 + $0x10] sm:$0xff] }
 0x432   :  { %v1237_v62 = vsub.f32 0.0, %v1230_v30  ;;  %v1223_v37 = vsub.f32 %v1209_v20, %v1216_v22 }
 0x433   :  { %v1243_v53 = vmul.f32 1.442695, %v1236_v61 }
 0x434   :  { %v1245_v63 = vmul.f32 1.442695, %v1237_v62  ;;  %v913_v62 = vrot.slane %v3100_v52, %v912_v55 }
 0x435   :  { %1820 = vpow2.f32 %v1243_v53 }
 0x436   :  { %1822 = vpow2.f32 %v1245_v63 }
 0x43f   :  { %v1821_v0 = vpop.eup %1820 }
 0x440   :  { %v1823_v2 = vpop.eup %1822  ;;  %v1257_v5 = vadd.f32 1.0, %v1821_v0  ;;  %v1260_v16 = vmul.f32 -0.5, %v1821_v0  ;;  %v1263_v14 = vand.u32 2147483647, %v1821_v0 }
 0x441   :  { %v1266_v6 = vadd.f32 1.0, %v1823_v2  ;;  %v1269_v7 = vmul.f32 -0.5, %v1823_v2  ;;  %v1272_v23 = vand.u32 2147483647, %v1823_v2 }
 0x442   :  { %1824 = vlog2.f32 %v1257_v5  ;;  %v1261_v12 = vadd.f32 1.0, %v1260_v16  ;;  %vm1264_vm4 = vcmp.lt.f32.partialorder %v1263_v14, 0.0004427343 }
 0x443   :  { %1826 = vlog2.f32 %v1266_v6  ;;  %v1270_v17 = vadd.f32 1.0, %v1269_v7  ;;  %vm1273_vm5 = vcmp.lt.f32.partialorder %v1272_v23, 0.0004427343 }
 0x444   :  { %v1262_v29 = vmul.f32 %v1821_v0, %v1261_v12 }
 0x445   :  { %v1271_v34 = vmul.f32 %v1823_v2, %v1270_v17  ;;  %v1851_v2 = vld [vmem:[%s3138_s0 + $0x18] sm:$0xff] }
 0x44c   :  { %v1825_v24 = vpop.eup %1824  ;;  %v1062_v25 = vpop.f32.mrb[6].mxu1 }
 0x44d   :  { %v1827_v26 = vpop.eup %1826  ;;  %v1259_v28 = vmul.f32 0.6931472, %v1825_v24  ;;  %v1063_v31 = vadd.f32 %v1062_v25, %v901_v13  ;;  %v1064_v32 = vpop.f32.mrb[7].mxu1 }
 0x44e   :  { %v1268_v33 = vmul.f32 0.6931472, %v1827_v26  ;;  %v1065_v35 = vadd.f32 %v1064_v32, %v905_v19 }
 0x44f   :  { %v1265_v36 = vsel %vm1264_vm4, %v1262_v29, %v1259_v28  ;;  %v1231_v38 = vand.u32 2147483647, %v1063_v31  ;;  %v1210_v59 = vmax.f32 %v1063_v31, 0.0  ;;  %v1217_v30 = vmul.f32 %v1850_v60, %v1063_v31 }
 0x450   :  { %v1320_v3 = vadd.f32 %v1265_v36, %v1222_v27  ;;  %v1274_v39 = vsel %vm1273_vm5, %v1271_v34, %v1268_v33  ;;  %v1232_v42 = vand.u32 2147483647, %v1065_v35  ;;  %v1211_v0 = vmax.f32 %v1065_v35, 0.0 }
 0x451   :  { %v1321_v40 = vadd.f32 %v1274_v39, %v1223_v37  ;;  %v1238_v41 = vsub.f32 0.0, %v1231_v38  ;;  %v1218_v5 = vmul.f32 %v1851_v2, %v1065_v35  ;;  %v1224_v11 = vsub.f32 %v1210_v59, %v1217_v30 }
 0x452   :  { %v1239_v45 = vsub.f32 0.0, %v1232_v42  ;;  %v916_v36 = vsub.s32 6, %v2705_v15 }
 0x453   :  { %v1327_v43 = vadd.f32 %v1321_v40, %v1320_v3  ;;  %v1247_v44 = vmul.f32 1.442695, %v1238_v41  ;;  %v1225_v20 = vsub.f32 %v1211_v0, %v1218_v5 }
 0x454   :  { %v1249_v46 = vmul.f32 1.442695, %v1239_v45  ;;  %v917_v3 = vrot.slane %v3100_v52, %v916_v36  ;;  %v1852_v45 = vld [vmem:[%s3138_s0 + $0x28] sm:$0xff] }
 0x455   :  { %1828 = vpow2.f32 %v1247_v44 }
 0x456   :  { %1830 = vpow2.f32 %v1249_v46 }
 0x45f   :  { %v1829_v47 = vpop.eup %1828 }
 0x460   :  { %v1275_v48 = vadd.f32 1.0, %v1829_v47  ;;  %v1831_v49 = vpop.eup %1830  ;;  %v1278_v51 = vmul.f32 -0.5, %v1829_v47  ;;  %v1281_v61 = vand.u32 2147483647, %v1829_v47 }
 0x461   :  { %v1284_v50 = vadd.f32 1.0, %v1831_v49  ;;  %v1287_v56 = vmul.f32 -0.5, %v1831_v49  ;;  %v1290_v6 = vand.u32 2147483647, %v1831_v49 }
 0x462   :  { %1832 = vlog2.f32 %v1275_v48  ;;  %v1279_v57 = vadd.f32 1.0, %v1278_v51  ;;  %vm1282_vm6 = vcmp.lt.f32.partialorder %v1281_v61, 0.0004427343 }
 0x463   :  { %1834 = vlog2.f32 %v1284_v50  ;;  %v1288_v53 = vadd.f32 1.0, %v1287_v56  ;;  %vm1291_vm7 = vcmp.lt.f32.partialorder %v1290_v6, 0.0004427343 }
 0x464   :  { %v1280_v7 = vmul.f32 %v1829_v47, %v1279_v57 }
 0x465   :  { %v1289_v17 = vmul.f32 %v1831_v49, %v1288_v53 }
 0x46c   :  { %v1833_v63 = vpop.eup %1832  ;;  %v1133_v16 = vpop.f32.mrb[8].mxu1 }
 0x46d   :  { %v1277_v18 = vmul.f32 0.6931472, %v1833_v63  ;;  %v1134_v8 = vadd.f32 %v1133_v16, %v909_v58  ;;  %v1135_v9 = vpop.f32.mrb[9].mxu1  ;;  %v1835_v10 = vpop.eup %1834 }
 0x46e   :  { %v1136_v12 = vadd.f32 %v1135_v9, %v913_v62  ;;  %v1286_v14 = vmul.f32 0.6931472, %v1835_v10 }
 0x46f   :  { %v1283_v13 = vsel %vm1282_vm6, %v1280_v7, %v1277_v18  ;;  %v1233_v21 = vand.u32 2147483647, %v1134_v8  ;;  %v1212_v39 = vmax.f32 %v1134_v8, 0.0  ;;  %v1219_v40 = vmul.f32 %v1134_v8, %v2676_v1 }
 0x470   :  { %v1322_v19 = vadd.f32 %v1283_v13, %v1224_v11  ;;  %v1292_v22 = vsel %vm1291_vm7, %v1289_v17, %v1286_v14  ;;  %v1234_v23 = vand.u32 2147483647, %v1136_v12  ;;  %v1213_v44 = vmax.f32 %v1136_v12, 0.0 }
 0x471   :  { %v1323_v24 = vadd.f32 %v1292_v22, %v1225_v20  ;;  %v1240_v25 = vsub.f32 0.0, %v1233_v21  ;;  %v1220_v46 = vmul.f32 %v1852_v45, %v1136_v12  ;;  %v1226_v54 = vsub.f32 %v1212_v39, %v1219_v40  ;;  %v1345_v20 = vpop.xlane.xlu0 %1344 }
 0x472   :  { %v1328_v26 = vadd.f32 %v1327_v43, %v1322_v19  ;;  %v1241_v27 = vsub.f32 0.0, %v1234_v23  ;;  %v1346_v21 = vmul.f32 -0.5, %v1345_v20 }
 0x473   :  { %v1251_v28 = vmul.f32 1.442695, %v1240_v25  ;;  %v1227_v58 = vsub.f32 %v1213_v44, %v1220_v46 }
 0x474   :  { %v1329_v29 = vadd.f32 %v1328_v26, %v1323_v24  ;;  %v1253_v31 = vmul.f32 1.442695, %v1241_v27 }
 0x475   :  { %1836 = vpow2.f32 %v1251_v28 }
 0x476   :  { %1838 = vpow2.f32 %v1253_v31 }
 0x47f   :  { %v1837_v32 = vpop.eup %1836 }
 0x480   :  { %v1839_v33 = vpop.eup %1838  ;;  %v1293_v34 = vadd.f32 1.0, %v1837_v32  ;;  %v1296_v37 = vmul.f32 -0.5, %v1837_v32  ;;  %v1299_v42 = vand.u32 2147483647, %v1837_v32 }
 0x481   :  { %v1302_v35 = vadd.f32 1.0, %v1839_v33  ;;  %v1305_v38 = vmul.f32 -0.5, %v1839_v33  ;;  %v1308_v48 = vand.u32 2147483647, %v1839_v33 }
 0x482   :  { %1840 = vlog2.f32 %v1293_v34  ;;  %v1297_v41 = vadd.f32 1.0, %v1296_v37  ;;  %vm1300_vm8 = vcmp.lt.f32.partialorder %v1299_v42, 0.0004427343 }
 0x483   :  { %1842 = vlog2.f32 %v1302_v35  ;;  %v1306_v43 = vadd.f32 1.0, %v1305_v38  ;;  %vm1309_vm9 = vcmp.lt.f32.partialorder %v1308_v48, 0.0004427343 }
 0x484   :  { %v1298_v55 = vmul.f32 %v1837_v32, %v1297_v41 }
 0x485   :  { %v1307_v57 = vmul.f32 %v1839_v33, %v1306_v43 }
 0x48c   :  { %v1204_v47 = vpop.f32.mrb[10].mxu1  ;;  %v1841_v49 = vpop.eup %1840 }
 0x48d   :  { %v1205_v15 = vadd.f32 %v1204_v47, %v917_v3  ;;  %v1423_v50 = vpop.f32.mrb[11].mxu1  ;;  %v1843_v51 = vpop.eup %1842  ;;  %v1295_v52 = vmul.f32 0.6931472, %v1841_v49 }
 0x48e   :  { %v1304_v1 = vmul.f32 0.6931472, %v1843_v51 }
 0x48f   :  { %v1235_v56 = vand.u32 2147483647, %v1205_v15  ;;  %v1301_v59 = vsel %vm1300_vm8, %v1298_v55, %v1295_v52  ;;  %v1214_v18 = vmax.f32 %v1205_v15, 0.0  ;;  %v1221_v7 = vmul.f32 %v1205_v15, %v2683_v4 }
 0x490   :  { %v1310_v30 = vsel %vm1309_vm9, %v1307_v57, %v1304_v1  ;;  %v1324_v61 = vadd.f32 %v1301_v59, %v1226_v54 }
 0x491   :  { %v1242_v60 = vsub.f32 0.0, %v1235_v56  ;;  %v1325_v62 = vadd.f32 %v1310_v30, %v1227_v58  ;;  %v1228_v12 = vsub.f32 %v1214_v18, %v1221_v7 }
 0x492   :  { %v1330_v63 = vadd.f32 %v1329_v29, %v1324_v61 }
 0x493   :  { %v1255_v53 = vmul.f32 1.442695, %v1242_v60 }
 0x494   :  { %v1331_v0 = vadd.f32 %v1330_v63, %v1325_v62 }
 0x495   :  { %1844 = vpow2.f32 %v1255_v53 }
 0x49f   :  { %v1845_v2 = vpop.eup %1844 }
 0x4a0   :  { %v1311_v5 = vadd.f32 1.0, %v1845_v2  ;;  %v1314_v6 = vmul.f32 -0.5, %v1845_v2  ;;  %v1317_v8 = vand.u32 2147483647, %v1845_v2 }
 0x4a2   :  { %1846 = vlog2.f32 %v1311_v5  ;;  %v1315_v16 = vadd.f32 1.0, %v1314_v6  ;;  %vm1318_vm10 = vcmp.lt.f32.partialorder %v1317_v8, 0.0004427343 }
 0x4a4   :  { %v1316_v11 = vmul.f32 %v1845_v2, %v1315_v16 }
 0x4ac   :  { %v1847_v9 = vpop.eup %1846 }
 0x4ad   :  { %v1313_v10 = vmul.f32 0.6931472, %v1847_v9 }
 0x4af   :  { %v1319_v13 = vsel %vm1318_vm10, %v1316_v11, %v1313_v10 }
 0x4b0   :  { %v1326_v14 = vadd.f32 %v1319_v13, %v1228_v12 }
 0x4b2   :  { %v1332_v17 = vsel %vm244_vm0, %v1326_v14, 0.0 }
 0x4b3   :  { %v1333_v19 = vadd.f32 %v1332_v17, %v1331_v0 }
 0x4b5   :  { %1334 = vadd.xlane.f32.xlu0 %v1333_v19 }
 0x542   :  { %v1335_v22 = vpop.xlane.xlu0 %1334 }
 0x543   :  { %v1347_v23 = vadd.f32 %v1346_v21, %v1335_v22 }
 0x545   :  { %1349 = vst.msk [vmem:[%s3144_s7] sm:$0xff] %vm1348_vm11, %v1347_v23 }

</bundles_post_ra>
